<compile_context>
chip_gen: v7x
topology: tpu7x:2x2x1
jax: 0.10.0
libtpu: 0.0.40
codegen_flags: <defaults>
</compile_context>

<pallas_src>
import functools

import jax
import jax.numpy as jnp
from jax.experimental import pallas as pl
from jax.experimental.pallas import tpu as pltpu


# ----------------------------- kernel helpers -----------------------------

def _layernorm(x, w, b, eps):
    # PyTorch LayerNorm: biased variance over the last dim, affine w, b. (f32)
    mean = jnp.mean(x, axis=-1, keepdims=True)
    var = jnp.mean((x - mean) ** 2, axis=-1, keepdims=True)
    return (x - mean) * jax.lax.rsqrt(var + eps) * w + b


# ------------------------------- the kernel -------------------------------

def attn_block_kernel(
    x_ref,
    ln1_w, ln1_b,
    wqkv, bqkv,
    qn_w, qn_b, kn_w, kn_b,
    wo, bo,
    ln2_w, ln2_b,
    w12, b12, w3, b3,
    o_ref,
    *, num_heads, head_dim, eps,
):
    # One grid step processes one batch element: x_ref is (N, D).
    N, D = x_ref.shape
    x = x_ref[...]                                          # f32 (N, D)

    # ---- attention branch: x + attn(norm1(x)) ----
    xn = _layernorm(x, ln1_w[0], ln1_b[0], eps)             # f32
    xn_h = jnp.broadcast_to(xn.astype(jnp.bfloat16), (num_heads, N, D))

    # Fused, head-major QKV projection: (H, N, 3*head_dim), f32 accumulate.
    qkv = jnp.einsum("hnd,hdk->hnk", xn_h, wqkv[...],
                     preferred_element_type=jnp.float32) + bqkv[...]
    q = qkv[:, :, :head_dim]
    k = qkv[:, :, head_dim:2 * head_dim]
    v = qkv[:, :, 2 * head_dim:]

    # qk-norm applied on the whole (H, N, head_dim) tensors (broadcast hoisted).
    qn = _layernorm(q, qn_w[0], qn_b[0], eps)
    kn = _layernorm(k, kn_w[0], kn_b[0], eps)

    scale = float(head_dim) ** -0.5
    s = jnp.einsum("hnd,hmd->hnm",
                   qn.astype(jnp.bfloat16), kn.astype(jnp.bfloat16),
                   preferred_element_type=jnp.float32) * scale
    s = s - jnp.max(s, axis=-1, keepdims=True)
    p = jnp.exp(s)
    p = p * pl.reciprocal(jnp.sum(p, axis=-1, keepdims=True), approx=True)

    o_h = jnp.einsum("hnm,hmd->hnd",
                     p.astype(jnp.bfloat16), v.astype(jnp.bfloat16),
                     preferred_element_type=jnp.float32)    # (H, N, head_dim)

    # Output projection, head-major weight (H, head_dim, D); concat(o) @ Wo
    # == sum_h o_h @ Wo_h, so reduce over the leading heads axis.
    proj = jnp.einsum("hnd,hde->hne",
                      o_h.astype(jnp.bfloat16), wo[...],
                      preferred_element_type=jnp.float32)   # (H, N, D)
    attn = jnp.sum(proj, axis=0) + bo[0]
    x = x + attn                                            # residual in f32

    # ---- MLP branch: x + w3(silu(w1(norm2 x)) * w2(norm2 x)) ----
    xn2 = _layernorm(x, ln2_w[0], ln2_b[0], eps)
    xn2_c = jnp.broadcast_to(xn2.astype(jnp.bfloat16), (2, N, D))
    h12 = jnp.einsum("cnd,cdh->cnh", xn2_c, w12[...],
                     preferred_element_type=jnp.float32) + b12[...]
    h1 = h12[0]
    h2 = h12[1]
    hh = h1 * jax.nn.sigmoid(h1) * h2                       # SiLU * gate, f32
    mlp = jnp.dot(hh.astype(jnp.bfloat16), w3[...],
                  preferred_element_type=jnp.float32) + b3[0]

    o_ref[...] = x + mlp


# ----------------------- param repacking for the kernel ----------------------

def _pack_params(params, *, num_heads, head_dim):
    (ln1_w, ln1_b, wq, bq, wk, bk, wv, bv, qn_w, qn_b, kn_w, kn_b,
     wo, bo, ln2_w, ln2_b, w1, b1, w2, b2, w3, b3) = params
    D = wq.shape[0]
    H, hd = num_heads, head_dim

    def heads_in_cols(w):        # (D, D) -> (H, D, hd)
        return w.reshape(D, H, hd).transpose(1, 0, 2)

    # Fused head-major QKV weight / bias.
    wqkv = jnp.concatenate(
        [heads_in_cols(wq), heads_in_cols(wk), heads_in_cols(wv)],
        axis=-1).astype(jnp.bfloat16)                        # (H, D, 3*hd)
    bqkv = jnp.concatenate(
        [bq[0].reshape(H, 1, hd), bk[0].reshape(H, 1, hd),
         bv[0].reshape(H, 1, hd)], axis=-1)                  # (H, 1, 3*hd) f32

    wo_h = wo.reshape(H, hd, D).astype(jnp.bfloat16)         # (H, hd, D)

    # Fused SwiGLU w1|w2 (stacked on a leading axis).
    w12 = jnp.stack([w1, w2], axis=0).astype(jnp.bfloat16)   # (2, D, hidden)
    b12 = jnp.stack([b1, b2], axis=0)                        # (2, 1, hidden) f32
    w3b = w3.astype(jnp.bfloat16)                            # (hidden, D)

    return [ln1_w, ln1_b, wqkv, bqkv, qn_w, qn_b, kn_w, kn_b,
            wo_h, bo, ln2_w, ln2_b, w12, b12, w3b, b3]


# ------------------------------- the wrapper -------------------------------

def attention_block_prompt_embedding(x, params, *, num_heads, head_dim, eps):
    B, N, D = x.shape
    packed = _pack_params(params, num_heads=num_heads, head_dim=head_dim)

    def full_spec(shape):
        nd = len(shape)
        return pl.BlockSpec(shape, lambda b, _nd=nd: (0,) * _nd)

    x_spec = pl.BlockSpec((None, N, D), lambda b: (b, 0, 0))
    out_spec = pl.BlockSpec((None, N, D), lambda b: (b, 0, 0))

    kernel = functools.partial(
        attn_block_kernel, num_heads=num_heads, head_dim=head_dim, eps=eps
    )

    return pl.pallas_call(
        kernel,
        out_shape=jax.ShapeDtypeStruct((B, N, D), jnp.float32),
        grid=(B,),
        in_specs=[x_spec] + [full_spec(p.shape) for p in packed],
        out_specs=out_spec,
        compiler_params=pltpu.CompilerParams(
            dimension_semantics=("parallel",)
        ),
    )(x, *packed)


# --------------------------- deterministic params ---------------------------

def make_params(key, dim, head_dim, mlp_ratio, multiple_of):
    # FeedForward hidden dim, exactly as the PyTorch module computes it.
    hidden = int(2 * int(dim * mlp_ratio) / 3)
    hidden = multiple_of * ((hidden + multiple_of - 1) // multiple_of)

    keys = jax.random.split(key, 16)
    std = 0.02

    def w(k, shape):
        return (std * jax.random.normal(k, shape)).astype(jnp.float32)

    def bias(k, n):
        return (0.01 * jax.random.normal(k, (1, n))).astype(jnp.float32)

    ones = lambda n: jnp.ones((1, n), jnp.float32)
    zeros = lambda n: jnp.zeros((1, n), jnp.float32)

    params = [
        ones(dim), zeros(dim),                       # norm1 (LayerNorm default init)
        w(keys[0], (dim, dim)), bias(keys[1], dim),  # Wq, bq
        w(keys[2], (dim, dim)), bias(keys[3], dim),  # Wk, bk
        w(keys[4], (dim, dim)), bias(keys[5], dim),  # Wv, bv
        ones(head_dim), zeros(head_dim),             # q-norm
        ones(head_dim), zeros(head_dim),             # k-norm
        w(keys[6], (dim, dim)), bias(keys[7], dim),  # Wo, bo
        ones(dim), zeros(dim),                       # norm2
        w(keys[8], (dim, hidden)), bias(keys[9], hidden),    # mlp w1
        w(keys[10], (dim, hidden)), bias(keys[11], hidden),  # mlp w2
        w(keys[12], (hidden, dim)), bias(keys[13], dim),     # mlp w3
    ]
    return params, hidden


# ------------------------------ JAX reference ------------------------------

def reference(x, params, *, num_heads, head_dim, eps):
    (ln1_w, ln1_b, wq, bq, wk, bk, wv, bv, qn_w, qn_b, kn_w, kn_b,
     wo, bo, ln2_w, ln2_b, w1, b1, w2, b2, w3, b3) = params

    def ln(v, wgt, b):
        m = v.mean(-1, keepdims=True)
        var = ((v - m) ** 2).mean(-1, keepdims=True)
        return (v - m) / jnp.sqrt(var + eps) * wgt[0] + b[0]

    B, N, D = x.shape
    hp = jax.lax.Precision.HIGHEST

    xn = ln(x, ln1_w, ln1_b)
    q = jnp.einsum("bnd,de->bne", xn, wq, precision=hp) + bq[0]
    k = jnp.einsum("bnd,de->bne", xn, wk, precision=hp) + bk[0]
    v = jnp.einsum("bnd,de->bne", xn, wv, precision=hp) + bv[0]

    def split(t):
        return t.reshape(B, N, num_heads, head_dim).transpose(0, 2, 1, 3)

    qh = ln(split(q), qn_w, qn_b)
    kh = ln(split(k), kn_w, kn_b)
    vh = split(v)

    s = jnp.einsum("bhnd,bhmd->bhnm", qh, kh, precision=hp) * (head_dim ** -0.5)
    p = jax.nn.softmax(s, axis=-1)
    o = jnp.einsum("bhnm,bhmd->bhnd", p, vh, precision=hp)
    o = o.transpose(0, 2, 1, 3).reshape(B, N, D)
    o = jnp.einsum("bnd,de->bne", o, wo, precision=hp) + bo[0]
    x = x + o

    xn2 = ln(x, ln2_w, ln2_b)
    h1 = jnp.einsum("bnd,dh->bnh", xn2, w1, precision=hp) + b1[0]
    h2 = jnp.einsum("bnd,dh->bnh", xn2, w2, precision=hp) + b2[0]
    hh = (h1 * jax.nn.sigmoid(h1)) * h2
    mlp = jnp.einsum("bnh,hd->bnd", hh, w3, precision=hp) + b3[0]
    return x + mlp


# ----------------------------------- main -----------------------------------

if __name__ == "__main__":
    B, N, D = 2, 8, 64          # batch, sequence, dim
    head_dim = 16               # -> num_heads = 4
    mlp_ratio = 4.0
    multiple_of = 32
    eps = 1e-6
    num_heads = D // head_dim

    key = jax.random.PRNGKey(0)
    kx, kp = jax.random.split(key)
    x = jax.random.normal(kx, (B, N, D), dtype=jnp.float32)
    params, hidden = make_params(kp, D, head_dim, mlp_ratio, multiple_of)

    out = attention_block_prompt_embedding(
        x, params, num_heads=num_heads, head_dim=head_dim, eps=eps
    )
    out = jax.block_until_ready(out)

    ref = reference(x, params, num_heads=num_heads, head_dim=head_dim, eps=eps)
    err = float(jnp.max(jnp.abs(out - ref)))
    assert out.shape == (B, N, D)
    # Tolerance accounts for bf16 MXU inputs vs. the f32 HIGHEST-precision ref
    # (residual path and all normalization/softmax math stay f32 in-kernel).
    assert err < 1e-2, f"max abs error too large: {err}"

    print("KERNEL_OK")
</pallas_src>

<mosaic_0001>
module attributes {stable_mosaic.version = 11 : i64} {
  func.func @attn_block_kernel(%arg0: i32, %arg1: memref<1x8x64xf32, #tpu.memory_space<vmem>>, %arg2: memref<1x64xf32, #tpu.memory_space<vmem>>, %arg3: memref<1x64xf32, #tpu.memory_space<vmem>>, %arg4: memref<4x64x48xbf16, #tpu.memory_space<vmem>>, %arg5: memref<4x1x48xf32, #tpu.memory_space<vmem>>, %arg6: memref<1x16xf32, #tpu.memory_space<vmem>>, %arg7: memref<1x16xf32, #tpu.memory_space<vmem>>, %arg8: memref<1x16xf32, #tpu.memory_space<vmem>>, %arg9: memref<1x16xf32, #tpu.memory_space<vmem>>, %arg10: memref<4x16x64xbf16, #tpu.memory_space<vmem>>, %arg11: memref<1x64xf32, #tpu.memory_space<vmem>>, %arg12: memref<1x64xf32, #tpu.memory_space<vmem>>, %arg13: memref<1x64xf32, #tpu.memory_space<vmem>>, %arg14: memref<2x64x192xbf16, #tpu.memory_space<vmem>>, %arg15: memref<2x1x192xf32, #tpu.memory_space<vmem>>, %arg16: memref<192x64xbf16, #tpu.memory_space<vmem>>, %arg17: memref<1x64xf32, #tpu.memory_space<vmem>>, %arg18: memref<1x8x64xf32, #tpu.memory_space<vmem>>) attributes {dimension_semantics = [#tpu.dimension_semantics<parallel>], iteration_bounds = array<i64: 2>, scalar_prefetch = 0 : i64, scratch_operands = 0 : i64, tpu.core_type = #tpu.core_type<tc>, window_params = [{transform_indices = @transform_0, window_bounds = array<i64: 1, 8, 64>}, {pipeline_mode = #tpu.pipeline_mode<synchronous>, transform_indices = @transform_1, window_bounds = array<i64: 1, 64>}, {pipeline_mode = #tpu.pipeline_mode<synchronous>, transform_indices = @transform_2, window_bounds = array<i64: 1, 64>}, {pipeline_mode = #tpu.pipeline_mode<synchronous>, transform_indices = @transform_3, window_bounds = array<i64: 4, 64, 48>}, {pipeline_mode = #tpu.pipeline_mode<synchronous>, transform_indices = @transform_4, window_bounds = array<i64: 4, 1, 48>}, {pipeline_mode = #tpu.pipeline_mode<synchronous>, transform_indices = @transform_5, window_bounds = array<i64: 1, 16>}, {pipeline_mode = #tpu.pipeline_mode<synchronous>, transform_indices = @transform_6, window_bounds = array<i64: 1, 16>}, {pipeline_mode = #tpu.pipeline_mode<synchronous>, transform_indices = @transform_7, window_bounds = array<i64: 1, 16>}, {pipeline_mode = #tpu.pipeline_mode<synchronous>, transform_indices = @transform_8, window_bounds = array<i64: 1, 16>}, {pipeline_mode = #tpu.pipeline_mode<synchronous>, transform_indices = @transform_9, window_bounds = array<i64: 4, 16, 64>}, {pipeline_mode = #tpu.pipeline_mode<synchronous>, transform_indices = @transform_10, window_bounds = array<i64: 1, 64>}, {pipeline_mode = #tpu.pipeline_mode<synchronous>, transform_indices = @transform_11, window_bounds = array<i64: 1, 64>}, {pipeline_mode = #tpu.pipeline_mode<synchronous>, transform_indices = @transform_12, window_bounds = array<i64: 1, 64>}, {pipeline_mode = #tpu.pipeline_mode<synchronous>, transform_indices = @transform_13, window_bounds = array<i64: 2, 64, 192>}, {pipeline_mode = #tpu.pipeline_mode<synchronous>, transform_indices = @transform_14, window_bounds = array<i64: 2, 1, 192>}, {pipeline_mode = #tpu.pipeline_mode<synchronous>, transform_indices = @transform_15, window_bounds = array<i64: 192, 64>}, {pipeline_mode = #tpu.pipeline_mode<synchronous>, transform_indices = @transform_16, window_bounds = array<i64: 1, 64>}, {transform_indices = @transform_17, window_bounds = array<i64: 1, 8, 64>}]} {
    %c0 = arith.constant 0 : index
    %c0_0 = arith.constant 0 : index
    %c0_1 = arith.constant 0 : index
    %0 = vector.load %arg1[%c0, %c0_0, %c0_1] : memref<1x8x64xf32, #tpu.memory_space<vmem>>, vector<1x8x64xf32>
    %1 = vector.shape_cast %0 : vector<1x8x64xf32> to vector<8x64xf32>
    %c0_2 = arith.constant 0 : index
    %c0_3 = arith.constant 0 : index
    %2 = vector.load %arg2[%c0_2, %c0_3] : memref<1x64xf32, #tpu.memory_space<vmem>>, vector<1x64xf32>
    %3 = vector.shape_cast %2 : vector<1x64xf32> to vector<64xf32>
    %c0_4 = arith.constant 0 : index
    %c0_5 = arith.constant 0 : index
    %4 = vector.load %arg3[%c0_4, %c0_5] : memref<1x64xf32, #tpu.memory_space<vmem>>, vector<1x64xf32>
    %5 = vector.shape_cast %4 : vector<1x64xf32> to vector<64xf32>
    %cst = arith.constant dense<0.000000e+00> : vector<8xf32>
    %6 = vector.multi_reduction <add>, %1, %cst [1] : vector<8x64xf32> to vector<8xf32>
    %7 = vector.shape_cast %6 : vector<8xf32> to vector<8x1xf32>
    %cst_6 = arith.constant 6.400000e+01 : f32
    %8 = vector.broadcast %cst_6 : f32 to vector<8x1xf32>
    %9 = arith.divf %7, %8 : vector<8x1xf32>
    %10 = vector.broadcast %9 : vector<8x1xf32> to vector<8x64xf32>
    %11 = arith.subf %1, %10 : vector<8x64xf32>
    %12 = arith.mulf %11, %11 : vector<8x64xf32>
    %cst_7 = arith.constant dense<0.000000e+00> : vector<8xf32>
    %13 = vector.multi_reduction <add>, %12, %cst_7 [1] : vector<8x64xf32> to vector<8xf32>
    %14 = vector.shape_cast %13 : vector<8xf32> to vector<8x1xf32>
    %cst_8 = arith.constant 6.400000e+01 : f32
    %15 = vector.broadcast %cst_8 : f32 to vector<8x1xf32>
    %16 = arith.divf %14, %15 : vector<8x1xf32>
    %17 = vector.broadcast %9 : vector<8x1xf32> to vector<8x64xf32>
    %18 = arith.subf %1, %17 : vector<8x64xf32>
    %cst_9 = arith.constant 9.99999997E-7 : f32
    %19 = vector.broadcast %cst_9 : f32 to vector<8x1xf32>
    %20 = arith.addf %16, %19 : vector<8x1xf32>
    %21 = math.rsqrt %20 : vector<8x1xf32>
    %22 = vector.broadcast %21 : vector<8x1xf32> to vector<8x64xf32>
    %23 = arith.mulf %18, %22 : vector<8x64xf32>
    %24 = vector.shape_cast %3 : vector<64xf32> to vector<1x64xf32>
    %25 = vector.broadcast %24 : vector<1x64xf32> to vector<8x64xf32>
    %26 = arith.mulf %23, %25 : vector<8x64xf32>
    %27 = vector.shape_cast %5 : vector<64xf32> to vector<1x64xf32>
    %28 = vector.broadcast %27 : vector<1x64xf32> to vector<8x64xf32>
    %29 = arith.addf %26, %28 : vector<8x64xf32>
    %30 = arith.truncf %29 : vector<8x64xf32> to vector<8x64xbf16>
    %31 = vector.shape_cast %30 : vector<8x64xbf16> to vector<1x8x64xbf16>
    %32 = vector.broadcast %31 : vector<1x8x64xbf16> to vector<4x8x64xbf16>
    %c0_10 = arith.constant 0 : index
    %c0_11 = arith.constant 0 : index
    %c0_12 = arith.constant 0 : index
    %33 = vector.load %arg4[%c0_10, %c0_11, %c0_12] : memref<4x64x48xbf16, #tpu.memory_space<vmem>>, vector<4x64x48xbf16>
    "tpu.trace_start"() <{level = 10 : i32, message = "hnd,hdk->hnk"}> : () -> ()
    %cst_13 = arith.constant dense<0.000000e+00> : vector<4x8x48xf32>
    %34 = tpu.matmul %32, %33, %cst_13 {dimension_numbers = #tpu.dot_dimension_numbers<[2], [1], [1], [2], [0, 0, 0, 1, 1, 2], [0], [0]>} : vector<4x8x64xbf16>, vector<4x64x48xbf16>, vector<4x8x48xf32> -> vector<4x8x48xf32>
    "tpu.trace_stop"() : () -> ()
    %c0_14 = arith.constant 0 : index
    %c0_15 = arith.constant 0 : index
    %c0_16 = arith.constant 0 : index
    %35 = vector.load %arg5[%c0_14, %c0_15, %c0_16] : memref<4x1x48xf32, #tpu.memory_space<vmem>>, vector<4x1x48xf32>
    %36 = vector.broadcast %35 : vector<4x1x48xf32> to vector<4x8x48xf32>
    %37 = arith.addf %34, %36 : vector<4x8x48xf32>
    %38 = vector.extract_strided_slice %37 {offsets = [0, 0, 0], sizes = [4, 8, 16], strides = [1, 1, 1]} : vector<4x8x48xf32> to vector<4x8x16xf32>
    %39 = vector.extract_strided_slice %37 {offsets = [0, 0, 16], sizes = [4, 8, 16], strides = [1, 1, 1]} : vector<4x8x48xf32> to vector<4x8x16xf32>
    %40 = vector.extract_strided_slice %37 {offsets = [0, 0, 32], sizes = [4, 8, 16], strides = [1, 1, 1]} : vector<4x8x48xf32> to vector<4x8x16xf32>
    %c0_17 = arith.constant 0 : index
    %c0_18 = arith.constant 0 : index
    %41 = vector.load %arg6[%c0_17, %c0_18] : memref<1x16xf32, #tpu.memory_space<vmem>>, vector<1x16xf32>
    %42 = vector.shape_cast %41 : vector<1x16xf32> to vector<16xf32>
    %c0_19 = arith.constant 0 : index
    %c0_20 = arith.constant 0 : index
    %43 = vector.load %arg7[%c0_19, %c0_20] : memref<1x16xf32, #tpu.memory_space<vmem>>, vector<1x16xf32>
    %44 = vector.shape_cast %43 : vector<1x16xf32> to vector<16xf32>
    %cst_21 = arith.constant dense<0.000000e+00> : vector<4x8xf32>
    %45 = vector.multi_reduction <add>, %38, %cst_21 [2] : vector<4x8x16xf32> to vector<4x8xf32>
    %46 = vector.shape_cast %45 : vector<4x8xf32> to vector<4x8x1xf32>
    %cst_22 = arith.constant 1.600000e+01 : f32
    %47 = vector.broadcast %cst_22 : f32 to vector<4x8x1xf32>
    %48 = arith.divf %46, %47 : vector<4x8x1xf32>
    %49 = vector.broadcast %48 : vector<4x8x1xf32> to vector<4x8x16xf32>
    %50 = arith.subf %38, %49 : vector<4x8x16xf32>
    %51 = arith.mulf %50, %50 : vector<4x8x16xf32>
    %cst_23 = arith.constant dense<0.000000e+00> : vector<4x8xf32>
    %52 = vector.multi_reduction <add>, %51, %cst_23 [2] : vector<4x8x16xf32> to vector<4x8xf32>
    %53 = vector.shape_cast %52 : vector<4x8xf32> to vector<4x8x1xf32>
    %cst_24 = arith.constant 1.600000e+01 : f32
    %54 = vector.broadcast %cst_24 : f32 to vector<4x8x1xf32>
    %55 = arith.divf %53, %54 : vector<4x8x1xf32>
    %56 = vector.broadcast %48 : vector<4x8x1xf32> to vector<4x8x16xf32>
    %57 = arith.subf %38, %56 : vector<4x8x16xf32>
    %cst_25 = arith.constant 9.99999997E-7 : f32
    %58 = vector.broadcast %cst_25 : f32 to vector<4x8x1xf32>
    %59 = arith.addf %55, %58 : vector<4x8x1xf32>
    %60 = math.rsqrt %59 : vector<4x8x1xf32>
    %61 = vector.broadcast %60 : vector<4x8x1xf32> to vector<4x8x16xf32>
    %62 = arith.mulf %57, %61 : vector<4x8x16xf32>
    %63 = vector.shape_cast %42 : vector<16xf32> to vector<1x1x16xf32>
    %64 = vector.broadcast %63 : vector<1x1x16xf32> to vector<4x8x16xf32>
    %65 = arith.mulf %62, %64 : vector<4x8x16xf32>
    %66 = vector.shape_cast %44 : vector<16xf32> to vector<1x1x16xf32>
    %67 = vector.broadcast %66 : vector<1x1x16xf32> to vector<4x8x16xf32>
    %68 = arith.addf %65, %67 : vector<4x8x16xf32>
    %c0_26 = arith.constant 0 : index
    %c0_27 = arith.constant 0 : index
    %69 = vector.load %arg8[%c0_26, %c0_27] : memref<1x16xf32, #tpu.memory_space<vmem>>, vector<1x16xf32>
    %70 = vector.shape_cast %69 : vector<1x16xf32> to vector<16xf32>
    %c0_28 = arith.constant 0 : index
    %c0_29 = arith.constant 0 : index
    %71 = vector.load %arg9[%c0_28, %c0_29] : memref<1x16xf32, #tpu.memory_space<vmem>>, vector<1x16xf32>
    %72 = vector.shape_cast %71 : vector<1x16xf32> to vector<16xf32>
    %cst_30 = arith.constant dense<0.000000e+00> : vector<4x8xf32>
    %73 = vector.multi_reduction <add>, %39, %cst_30 [2] : vector<4x8x16xf32> to vector<4x8xf32>
    %74 = vector.shape_cast %73 : vector<4x8xf32> to vector<4x8x1xf32>
    %cst_31 = arith.constant 1.600000e+01 : f32
    %75 = vector.broadcast %cst_31 : f32 to vector<4x8x1xf32>
    %76 = arith.divf %74, %75 : vector<4x8x1xf32>
    %77 = vector.broadcast %76 : vector<4x8x1xf32> to vector<4x8x16xf32>
    %78 = arith.subf %39, %77 : vector<4x8x16xf32>
    %79 = arith.mulf %78, %78 : vector<4x8x16xf32>
    %cst_32 = arith.constant dense<0.000000e+00> : vector<4x8xf32>
    %80 = vector.multi_reduction <add>, %79, %cst_32 [2] : vector<4x8x16xf32> to vector<4x8xf32>
    %81 = vector.shape_cast %80 : vector<4x8xf32> to vector<4x8x1xf32>
    %cst_33 = arith.constant 1.600000e+01 : f32
    %82 = vector.broadcast %cst_33 : f32 to vector<4x8x1xf32>
    %83 = arith.divf %81, %82 : vector<4x8x1xf32>
    %84 = vector.broadcast %76 : vector<4x8x1xf32> to vector<4x8x16xf32>
    %85 = arith.subf %39, %84 : vector<4x8x16xf32>
    %cst_34 = arith.constant 9.99999997E-7 : f32
    %86 = vector.broadcast %cst_34 : f32 to vector<4x8x1xf32>
    %87 = arith.addf %83, %86 : vector<4x8x1xf32>
    %88 = math.rsqrt %87 : vector<4x8x1xf32>
    %89 = vector.broadcast %88 : vector<4x8x1xf32> to vector<4x8x16xf32>
    %90 = arith.mulf %85, %89 : vector<4x8x16xf32>
    %91 = vector.shape_cast %70 : vector<16xf32> to vector<1x1x16xf32>
    %92 = vector.broadcast %91 : vector<1x1x16xf32> to vector<4x8x16xf32>
    %93 = arith.mulf %90, %92 : vector<4x8x16xf32>
    %94 = vector.shape_cast %72 : vector<16xf32> to vector<1x1x16xf32>
    %95 = vector.broadcast %94 : vector<1x1x16xf32> to vector<4x8x16xf32>
    %96 = arith.addf %93, %95 : vector<4x8x16xf32>
    %97 = arith.truncf %68 : vector<4x8x16xf32> to vector<4x8x16xbf16>
    %98 = arith.truncf %96 : vector<4x8x16xf32> to vector<4x8x16xbf16>
    "tpu.trace_start"() <{level = 10 : i32, message = "hnd,hmd->hnm"}> : () -> ()
    %cst_35 = arith.constant dense<0.000000e+00> : vector<4x8x8xf32>
    %99 = tpu.matmul %97, %98, %cst_35 {dimension_numbers = #tpu.dot_dimension_numbers<[2], [2], [1], [1], [0, 0, 0, 1, 1, 1], [0], [0]>} : vector<4x8x16xbf16>, vector<4x8x16xbf16>, vector<4x8x8xf32> -> vector<4x8x8xf32>
    "tpu.trace_stop"() : () -> ()
    %cst_36 = arith.constant 2.500000e-01 : f32
    %100 = vector.broadcast %cst_36 : f32 to vector<4x8x8xf32>
    %101 = arith.mulf %99, %100 : vector<4x8x8xf32>
    %cst_37 = arith.constant dense<0xFF800000> : vector<4x8xf32>
    %102 = vector.multi_reduction <maximumf>, %101, %cst_37 [2] : vector<4x8x8xf32> to vector<4x8xf32>
    %103 = vector.shape_cast %102 : vector<4x8xf32> to vector<4x8x1xf32>
    %104 = vector.broadcast %103 : vector<4x8x1xf32> to vector<4x8x8xf32>
    %105 = arith.subf %101, %104 : vector<4x8x8xf32>
    %106 = math.exp %105 : vector<4x8x8xf32>
    %cst_38 = arith.constant dense<0.000000e+00> : vector<4x8xf32>
    %107 = vector.multi_reduction <add>, %106, %cst_38 [2] : vector<4x8x8xf32> to vector<4x8xf32>
    %108 = vector.shape_cast %107 : vector<4x8xf32> to vector<4x8x1xf32>
    %109 = tpu.reciprocal %108 {approx = true} : vector<4x8x1xf32> -> vector<4x8x1xf32>
    %110 = vector.broadcast %109 : vector<4x8x1xf32> to vector<4x8x8xf32>
    %111 = arith.mulf %106, %110 : vector<4x8x8xf32>
    %112 = arith.truncf %111 : vector<4x8x8xf32> to vector<4x8x8xbf16>
    %113 = arith.truncf %40 : vector<4x8x16xf32> to vector<4x8x16xbf16>
    "tpu.trace_start"() <{level = 10 : i32, message = "hnm,hmd->hnd"}> : () -> ()
    %cst_39 = arith.constant dense<0.000000e+00> : vector<4x8x16xf32>
    %114 = tpu.matmul %112, %113, %cst_39 {dimension_numbers = #tpu.dot_dimension_numbers<[2], [1], [1], [2], [0, 0, 0, 1, 1, 2], [0], [0]>} : vector<4x8x8xbf16>, vector<4x8x16xbf16>, vector<4x8x16xf32> -> vector<4x8x16xf32>
    "tpu.trace_stop"() : () -> ()
    %115 = arith.truncf %114 : vector<4x8x16xf32> to vector<4x8x16xbf16>
    %c0_40 = arith.constant 0 : index
    %c0_41 = arith.constant 0 : index
    %c0_42 = arith.constant 0 : index
    %116 = vector.load %arg10[%c0_40, %c0_41, %c0_42] : memref<4x16x64xbf16, #tpu.memory_space<vmem>>, vector<4x16x64xbf16>
    "tpu.trace_start"() <{level = 10 : i32, message = "hnd,hde->hne"}> : () -> ()
    %cst_43 = arith.constant dense<0.000000e+00> : vector<4x8x64xf32>
    %117 = tpu.matmul %115, %116, %cst_43 {dimension_numbers = #tpu.dot_dimension_numbers<[2], [1], [1], [2], [0, 0, 0, 1, 1, 2], [0], [0]>} : vector<4x8x16xbf16>, vector<4x16x64xbf16>, vector<4x8x64xf32> -> vector<4x8x64xf32>
    "tpu.trace_stop"() : () -> ()
    %cst_44 = arith.constant dense<0.000000e+00> : vector<8x64xf32>
    %118 = vector.multi_reduction <add>, %117, %cst_44 [0] : vector<4x8x64xf32> to vector<8x64xf32>
    %c0_45 = arith.constant 0 : index
    %c0_46 = arith.constant 0 : index
    %119 = vector.load %arg11[%c0_45, %c0_46] : memref<1x64xf32, #tpu.memory_space<vmem>>, vector<1x64xf32>
    %120 = vector.shape_cast %119 : vector<1x64xf32> to vector<64xf32>
    %121 = vector.shape_cast %120 : vector<64xf32> to vector<1x64xf32>
    %122 = vector.broadcast %121 : vector<1x64xf32> to vector<8x64xf32>
    %123 = arith.addf %118, %122 : vector<8x64xf32>
    %124 = arith.addf %1, %123 : vector<8x64xf32>
    %c0_47 = arith.constant 0 : index
    %c0_48 = arith.constant 0 : index
    %125 = vector.load %arg12[%c0_47, %c0_48] : memref<1x64xf32, #tpu.memory_space<vmem>>, vector<1x64xf32>
    %126 = vector.shape_cast %125 : vector<1x64xf32> to vector<64xf32>
    %c0_49 = arith.constant 0 : index
    %c0_50 = arith.constant 0 : index
    %127 = vector.load %arg13[%c0_49, %c0_50] : memref<1x64xf32, #tpu.memory_space<vmem>>, vector<1x64xf32>
    %128 = vector.shape_cast %127 : vector<1x64xf32> to vector<64xf32>
    %cst_51 = arith.constant dense<0.000000e+00> : vector<8xf32>
    %129 = vector.multi_reduction <add>, %124, %cst_51 [1] : vector<8x64xf32> to vector<8xf32>
    %130 = vector.shape_cast %129 : vector<8xf32> to vector<8x1xf32>
    %cst_52 = arith.constant 6.400000e+01 : f32
    %131 = vector.broadcast %cst_52 : f32 to vector<8x1xf32>
    %132 = arith.divf %130, %131 : vector<8x1xf32>
    %133 = vector.broadcast %132 : vector<8x1xf32> to vector<8x64xf32>
    %134 = arith.subf %124, %133 : vector<8x64xf32>
    %135 = arith.mulf %134, %134 : vector<8x64xf32>
    %cst_53 = arith.constant dense<0.000000e+00> : vector<8xf32>
    %136 = vector.multi_reduction <add>, %135, %cst_53 [1] : vector<8x64xf32> to vector<8xf32>
    %137 = vector.shape_cast %136 : vector<8xf32> to vector<8x1xf32>
    %cst_54 = arith.constant 6.400000e+01 : f32
    %138 = vector.broadcast %cst_54 : f32 to vector<8x1xf32>
    %139 = arith.divf %137, %138 : vector<8x1xf32>
    %140 = vector.broadcast %132 : vector<8x1xf32> to vector<8x64xf32>
    %141 = arith.subf %124, %140 : vector<8x64xf32>
    %cst_55 = arith.constant 9.99999997E-7 : f32
    %142 = vector.broadcast %cst_55 : f32 to vector<8x1xf32>
    %143 = arith.addf %139, %142 : vector<8x1xf32>
    %144 = math.rsqrt %143 : vector<8x1xf32>
    %145 = vector.broadcast %144 : vector<8x1xf32> to vector<8x64xf32>
    %146 = arith.mulf %141, %145 : vector<8x64xf32>
    %147 = vector.shape_cast %126 : vector<64xf32> to vector<1x64xf32>
    %148 = vector.broadcast %147 : vector<1x64xf32> to vector<8x64xf32>
    %149 = arith.mulf %146, %148 : vector<8x64xf32>
    %150 = vector.shape_cast %128 : vector<64xf32> to vector<1x64xf32>
    %151 = vector.broadcast %150 : vector<1x64xf32> to vector<8x64xf32>
    %152 = arith.addf %149, %151 : vector<8x64xf32>
    %153 = arith.truncf %152 : vector<8x64xf32> to vector<8x64xbf16>
    %154 = vector.shape_cast %153 : vector<8x64xbf16> to vector<1x8x64xbf16>
    %155 = vector.broadcast %154 : vector<1x8x64xbf16> to vector<2x8x64xbf16>
    %c0_56 = arith.constant 0 : index
    %c0_57 = arith.constant 0 : index
    %c0_58 = arith.constant 0 : index
    %156 = vector.load %arg14[%c0_56, %c0_57, %c0_58] : memref<2x64x192xbf16, #tpu.memory_space<vmem>>, vector<2x64x192xbf16>
    "tpu.trace_start"() <{level = 10 : i32, message = "cnd,cdh->cnh"}> : () -> ()
    %cst_59 = arith.constant dense<0.000000e+00> : vector<2x8x192xf32>
    %157 = tpu.matmul %155, %156, %cst_59 {dimension_numbers = #tpu.dot_dimension_numbers<[2], [1], [1], [2], [0, 0, 0, 1, 1, 2], [0], [0]>} : vector<2x8x64xbf16>, vector<2x64x192xbf16>, vector<2x8x192xf32> -> vector<2x8x192xf32>
    "tpu.trace_stop"() : () -> ()
    %c0_60 = arith.constant 0 : index
    %c0_61 = arith.constant 0 : index
    %c0_62 = arith.constant 0 : index
    %158 = vector.load %arg15[%c0_60, %c0_61, %c0_62] : memref<2x1x192xf32, #tpu.memory_space<vmem>>, vector<2x1x192xf32>
    %159 = vector.broadcast %158 : vector<2x1x192xf32> to vector<2x8x192xf32>
    %160 = arith.addf %157, %159 : vector<2x8x192xf32>
    %161 = vector.extract_strided_slice %160 {offsets = [0, 0, 0], sizes = [1, 8, 192], strides = [1, 1, 1]} : vector<2x8x192xf32> to vector<1x8x192xf32>
    %162 = vector.shape_cast %161 : vector<1x8x192xf32> to vector<8x192xf32>
    %163 = vector.extract_strided_slice %160 {offsets = [1, 0, 0], sizes = [1, 8, 192], strides = [1, 1, 1]} : vector<2x8x192xf32> to vector<1x8x192xf32>
    %164 = vector.shape_cast %163 : vector<1x8x192xf32> to vector<8x192xf32>
    %165 = arith.negf %162 : vector<8x192xf32>
    %166 = math.exp %165 : vector<8x192xf32>
    %cst_63 = arith.constant 1.000000e+00 : f32
    %167 = vector.broadcast %cst_63 : f32 to vector<8x192xf32>
    %168 = arith.addf %167, %166 : vector<8x192xf32>
    %169 = arith.divf %167, %168 : vector<8x192xf32>
    %170 = arith.mulf %162, %169 : vector<8x192xf32>
    %171 = arith.mulf %170, %164 : vector<8x192xf32>
    %172 = arith.truncf %171 : vector<8x192xf32> to vector<8x192xbf16>
    %c0_64 = arith.constant 0 : index
    %c0_65 = arith.constant 0 : index
    %173 = vector.load %arg16[%c0_64, %c0_65] : memref<192x64xbf16, #tpu.memory_space<vmem>>, vector<192x64xbf16>
    %cst_66 = arith.constant dense<0.000000e+00> : vector<8x64xf32>
    %174 = tpu.matmul %172, %173, %cst_66 {dimension_numbers = #tpu.dot_dimension_numbers<[1], [0], [0], [1], [0, 0, 1, 1], [], []>} : vector<8x192xbf16>, vector<192x64xbf16>, vector<8x64xf32> -> vector<8x64xf32>
    %c0_67 = arith.constant 0 : index
    %c0_68 = arith.constant 0 : index
    %175 = vector.load %arg17[%c0_67, %c0_68] : memref<1x64xf32, #tpu.memory_space<vmem>>, vector<1x64xf32>
    %176 = vector.shape_cast %175 : vector<1x64xf32> to vector<64xf32>
    %177 = vector.shape_cast %176 : vector<64xf32> to vector<1x64xf32>
    %178 = vector.broadcast %177 : vector<1x64xf32> to vector<8x64xf32>
    %179 = arith.addf %174, %178 : vector<8x64xf32>
    %180 = arith.addf %124, %179 : vector<8x64xf32>
    %c0_69 = arith.constant 0 : index
    %c0_70 = arith.constant 0 : index
    %c0_71 = arith.constant 0 : index
    %181 = vector.load %arg18[%c0_69, %c0_70, %c0_71] : memref<1x8x64xf32, #tpu.memory_space<vmem>>, vector<1x8x64xf32>
    %182 = vector.shape_cast %181 : vector<1x8x64xf32> to vector<8x64xf32>
    %183 = vector.shape_cast %180 : vector<8x64xf32> to vector<1x8x64xf32>
    tpu.vector_store %arg18[%c0_69, %c0_70, %c0_71], %183 {strides = array<i32>} : memref<1x8x64xf32, #tpu.memory_space<vmem>>, vector<1x8x64xf32>,
    return
  }
  func.func @transform_0(%arg0: i32) -> (i32, i32, i32) {
    %c0_i32 = arith.constant 0 : i32
    %c0_i32_0 = arith.constant 0 : i32
    %c0_i32_1 = arith.constant 0 : i32
    return %arg0, %c0_i32, %c0_i32_0 : i32, i32, i32
  }
  func.func @transform_1(%arg0: i32) -> (i32, i32) {
    %c0_i32 = arith.constant 0 : i32
    %c0_i32_0 = arith.constant 0 : i32
    %c0_i32_1 = arith.constant 0 : i32
    return %c0_i32, %c0_i32_0 : i32, i32
  }
  func.func @transform_2(%arg0: i32) -> (i32, i32) {
    %c0_i32 = arith.constant 0 : i32
    %c0_i32_0 = arith.constant 0 : i32
    %c0_i32_1 = arith.constant 0 : i32
    return %c0_i32, %c0_i32_0 : i32, i32
  }
  func.func @transform_3(%arg0: i32) -> (i32, i32, i32) {
    %c0_i32 = arith.constant 0 : i32
    %c0_i32_0 = arith.constant 0 : i32
    %c0_i32_1 = arith.constant 0 : i32
    %c0_i32_2 = arith.constant 0 : i32
    return %c0_i32, %c0_i32_0, %c0_i32_1 : i32, i32, i32
  }
  func.func @transform_4(%arg0: i32) -> (i32, i32, i32) {
    %c0_i32 = arith.constant 0 : i32
    %c0_i32_0 = arith.constant 0 : i32
    %c0_i32_1 = arith.constant 0 : i32
    %c0_i32_2 = arith.constant 0 : i32
    return %c0_i32, %c0_i32_0, %c0_i32_1 : i32, i32, i32
  }
  func.func @transform_5(%arg0: i32) -> (i32, i32) {
    %c0_i32 = arith.constant 0 : i32
    %c0_i32_0 = arith.constant 0 : i32
    %c0_i32_1 = arith.constant 0 : i32
    return %c0_i32, %c0_i32_0 : i32, i32
  }
  func.func @transform_6(%arg0: i32) -> (i32, i32) {
    %c0_i32 = arith.constant 0 : i32
    %c0_i32_0 = arith.constant 0 : i32
    %c0_i32_1 = arith.constant 0 : i32
    return %c0_i32, %c0_i32_0 : i32, i32
  }
  func.func @transform_7(%arg0: i32) -> (i32, i32) {
    %c0_i32 = arith.constant 0 : i32
    %c0_i32_0 = arith.constant 0 : i32
    %c0_i32_1 = arith.constant 0 : i32
    return %c0_i32, %c0_i32_0 : i32, i32
  }
  func.func @transform_8(%arg0: i32) -> (i32, i32) {
    %c0_i32 = arith.constant 0 : i32
    %c0_i32_0 = arith.constant 0 : i32
    %c0_i32_1 = arith.constant 0 : i32
    return %c0_i32, %c0_i32_0 : i32, i32
  }
  func.func @transform_9(%arg0: i32) -> (i32, i32, i32) {
    %c0_i32 = arith.constant 0 : i32
    %c0_i32_0 = arith.constant 0 : i32
    %c0_i32_1 = arith.constant 0 : i32
    %c0_i32_2 = arith.constant 0 : i32
    return %c0_i32, %c0_i32_0, %c0_i32_1 : i32, i32, i32
  }
  func.func @transform_10(%arg0: i32) -> (i32, i32) {
    %c0_i32 = arith.constant 0 : i32
    %c0_i32_0 = arith.constant 0 : i32
    %c0_i32_1 = arith.constant 0 : i32
    return %c0_i32, %c0_i32_0 : i32, i32
  }
  func.func @transform_11(%arg0: i32) -> (i32, i32) {
    %c0_i32 = arith.constant 0 : i32
    %c0_i32_0 = arith.constant 0 : i32
    %c0_i32_1 = arith.constant 0 : i32
    return %c0_i32, %c0_i32_0 : i32, i32
  }
  func.func @transform_12(%arg0: i32) -> (i32, i32) {
    %c0_i32 = arith.constant 0 : i32
    %c0_i32_0 = arith.constant 0 : i32
    %c0_i32_1 = arith.constant 0 : i32
    return %c0_i32, %c0_i32_0 : i32, i32
  }
  func.func @transform_13(%arg0: i32) -> (i32, i32, i32) {
    %c0_i32 = arith.constant 0 : i32
    %c0_i32_0 = arith.constant 0 : i32
    %c0_i32_1 = arith.constant 0 : i32
    %c0_i32_2 = arith.constant 0 : i32
    return %c0_i32, %c0_i32_0, %c0_i32_1 : i32, i32, i32
  }
  func.func @transform_14(%arg0: i32) -> (i32, i32, i32) {
    %c0_i32 = arith.constant 0 : i32
    %c0_i32_0 = arith.constant 0 : i32
    %c0_i32_1 = arith.constant 0 : i32
    %c0_i32_2 = arith.constant 0 : i32
    return %c0_i32, %c0_i32_0, %c0_i32_1 : i32, i32, i32
  }
  func.func @transform_15(%arg0: i32) -> (i32, i32) {
    %c0_i32 = arith.constant 0 : i32
    %c0_i32_0 = arith.constant 0 : i32
    %c0_i32_1 = arith.constant 0 : i32
    return %c0_i32, %c0_i32_0 : i32, i32
  }
  func.func @transform_16(%arg0: i32) -> (i32, i32) {
    %c0_i32 = arith.constant 0 : i32
    %c0_i32_0 = arith.constant 0 : i32
    %c0_i32_1 = arith.constant 0 : i32
    return %c0_i32, %c0_i32_0 : i32, i32
  }
  func.func @transform_17(%arg0: i32) -> (i32, i32, i32) {
    %c0_i32 = arith.constant 0 : i32
    %c0_i32_0 = arith.constant 0 : i32
    %c0_i32_1 = arith.constant 0 : i32
    return %arg0, %c0_i32, %c0_i32_0 : i32, i32, i32
  }
}

</mosaic_0001>

<bundles_post_ra>
// kernel: tpu_custom_call.1
= control target key start
LH: loop header
LB: loop body
LE: loop exit
PB: predicated region body
PF: predicated region fallthrough
CT: control target
= control target key end

     0   :  { %s3312_s0 = inlined_call_operand.vmem [shape: f32[2,8,64], index: 0, kind: input, shape index: {}]   ;;  %s3313_s1 = inlined_call_operand.vmem [shape: f32[1,64], index: 1, kind: input, shape index: {}]   ;;  %s3314_s2 = inlined_call_operand.vmem [shape: f32[1,64], index: 2, kind: input, shape index: {}]   ;;  %s3315_s3 = inlined_call_operand.vmem [shape: bf16[4,64,48], index: 3, kind: input, shape index: {}]   ;;  %s3316_s4 = inlined_call_operand.vmem [shape: f32[4,1,48], index: 4, kind: input, shape index: {}]   ;;  %s3317_s5 = inlined_call_operand.vmem [shape: f32[1,16], index: 5, kind: input, shape index: {}]   ;;  %s3318_s6 = inlined_call_operand.vmem [shape: f32[1,16], index: 6, kind: input, shape index: {}]   ;;  %s3319_s7 = inlined_call_operand.vmem [shape: f32[1,16], index: 7, kind: input, shape index: {}]   ;;  %s3320_s8 = inlined_call_operand.vmem [shape: f32[1,16], index: 8, kind: input, shape index: {}]   ;;  %s3321_s9 = inlined_call_operand.vmem [shape: bf16[4,16,64], index: 9, kind: input, shape index: {}]   ;;  %s3322_s10 = inlined_call_operand.vmem [shape: f32[1,64], index: 10, kind: input, shape index: {}]   ;;  %s3323_s11 = inlined_call_operand.vmem [shape: f32[1,64], index: 11, kind: input, shape index: {}]   ;;  %s3324_s12 = inlined_call_operand.vmem [shape: f32[1,64], index: 12, kind: input, shape index: {}]   ;;  %s3325_s13 = inlined_call_operand.vmem [shape: bf16[2,64,192], index: 13, kind: input, shape index: {}]   ;;  %s3326_s14 = inlined_call_operand.vmem [shape: f32[2,1,192], index: 14, kind: input, shape index: {}]   ;;  %s3327_s15 = inlined_call_operand.vmem [shape: bf16[192,64], index: 15, kind: input, shape index: {}]   ;;  %s3328_s16 = inlined_call_operand.vmem [shape: f32[1,64], index: 16, kind: input, shape index: {}]   ;;  %s3329_s17 = inlined_call_operand.hbm [shape: f32[2,8,64], index: 17, kind: output, shape index: {}]  }
   0x1   :  { %3333 = sst [smem:[#allocation8_spill]] %s3312_s0 }
   0x2   :  { %3334 = sst [smem:[#allocation9_spill]] %s3313_s1 }
   0x3   :  { %3335 = sst [smem:[#allocation10_spill]] %s3314_s2 }
   0x4   :  { %3336 = sst [smem:[#allocation11_spill]] %s3315_s3 }
   0x5   :  { %22 = vsyncpa [#allocation3], 0 }
   0x6   :  { %24 = vsyncpa [#allocation3 + $0x1], 0  ;;  %s2803_s24 = smov 0   ;;  %s2805_s25 = smov 0  }
   0x7   :  { %s2807_s26 = smov 0   ;;  %s2809_s27 = smov 0  }
   0x8 LB: > { %3337 = sst [smem:[#allocation5_spill]] %s2700_s26  ;;  %s2824_s28 = sadd.s32 4294967295, %s2704_s27   ;;  %s2704_s27 = sphi %s2809_s27, %s3346_s27   ;;  %s2700_s26 = sphi %s2807_s26, %s3351_s26   ;;  %s2696_s25 = sphi %s2805_s25, %s3350_s25   ;;  %s2692_s24 = sphi %s2803_s24, %s3349_s24  }
   0x9   : > { %s2239_s29 = sadd.s32 4294967294, %s2704_s27   ;;  %s2828_s0 = sadd.s32 1, %s2704_s27  }
   0xa   : > { %3338 = sst [smem:[#allocation6_spill]] %s2828_s0  ;;  %s399_s30 = sadd.s32 1, %s2700_s26 }
   0xb   : > { %s396_s18 = ssub.s32 %s2704_s27, %s2828_s0  ;;  %p409_p0 = scmp.ne.s32.totalorder %s2700_s26, %s2696_s25 }
   0xc   : > { %p397_p1 = scmp.eq.s32.totalorder %s396_s18, 0  ;;  %p410_p2 = scmp.eq.s32.totalorder %s2824_s28, 1 }
   0xd   : > { %p415_p3 = scmp.ne.s32.totalorder %s2696_s25, %s2692_s24  ;;  %p416_p4 = scmp.eq.s32.totalorder %s2239_s29, 1 }
   0xe   : > { %s2839_s19 = scalar_select %p397_p1, %s2700_s26, %s399_s30  }
   0xf   : > { %p2841_p5 = por %p410_p2, %p409_p0  ;;  %p2845_p6 = por %p416_p4, %p415_p3 }
  0x10   : > { %3339 = sst [smem:[#allocation7_spill]] %s2839_s19  ;;  %p2242_p7 = scmp.ge.s32.totalorder %s2704_s27, 1 }
  0x11   : > { %p489_p8 = scmp.lt.s32.totalorder %s2704_s27, 3 }
  0x13   : > { %p490_p9 = pnand %p2242_p7, %p489_p8 }
  0x14   : > { %p540_p10 = scmp.lt.s32.totalorder (!%p490_p9), %s2824_s28, 1  ;;  %vm548_vm0 = vcmask (!%p490_p9), 523264   ;;  %s3342_s30 = sld [smem:[#allocation8_spill]] (!%p490_p9)  ;;  %v2706_v9 = vmov (!%p490_p9), 0.0   ;;  %vm2707_vm1 = vmmov (!%p490_p9), 0   ;;  %vm899_vm2 = vcmask (!%p490_p9), 130048  }
  0x15   : > { %493 = sbr.rel (%p490_p9) target bundleno = 3019 (0xbcb), region = 88  ;;  %s3343_s3 = sld [smem:[#allocation11_spill]] (!%p490_p9)  ;;  %2376 = vmatprep.subr.bf16.mxu1 (!%p490_p9), %v2706_v9  ;;  %2400 = vmatprep.subr.bf16.mxu0 (!%p490_p9), %v2706_v9  ;;  %v2247_v34 = vld [vmem:[%s3316_s4] ss:$0 sm:$0xff] (!%p490_p9)  ;;  %v2249_v35 = vld [vmem:[%s3316_s4 + $0x2] ss:$0 sm:$0xff] (!%p490_p9) }
  0x16   : > { %2384 = vmatprep.mubr.msk.bf16.mxu1 (!%p490_p9), %vm2707_vm1, %v2706_v9  ;;  %2408 = vmatprep.mubr.msk.bf16.mxu0 (!%p490_p9), %vm2707_vm1, %v2706_v9  ;;  %s3345_s2 = sld [smem:[#allocation10_spill]] (!%p490_p9)  ;;  %s2708_s19 = smov (!%p490_p9), 112   ;;  %v2248_v46 = vld [vmem:[%s3316_s4 + $0x1] ss:$0 sm:$0xff] (!%p490_p9)  ;;  %v2250_v52 = vld [vmem:[%s3316_s4 + $0x3] ss:$0 sm:$0xff] (!%p490_p9) }
  0x17   : > { %s2709_s26 = smov (!%p490_p9), 16   ;;  %vm1291_vm3 = vcmask (!%p490_p9), 64512   ;;  %vm1350_vm4 = vcmask (!%p490_p9), 1043456  }
  0x1b   : > { %v2541_v7 = vld [vmem:[%s3343_s3] sm:$0xff] (!%p490_p9)   ;;  %v2543_v10 = vld [vmem:[%s3343_s3 + $0x8] sm:$0xff] (!%p490_p9)   ;;  %v2545_v12 = vld [vmem:[%s3343_s3 + $0x10] sm:$0xff] (!%p490_p9)  }
  0x1c   : > { %s541_s21 = scalar_select %p540_p10, %s2824_s28, 1  ;;  %v2542_v8 = vld [vmem:[%s3343_s3 + $0x40] sm:$0xff]   ;;  %2377 = vmatpush3.bf16.msra.mxu1 %v2541_v7  ;;  %v2544_v11 = vld [vmem:[%s3343_s3 + $0x48] sm:$0xff]   ;;  %v2546_v13 = vld [vmem:[%s3343_s3 + $0x50] sm:$0xff]  }
  0x1d   : > { %2401 = vmatpush3.bf16.msra.mxu0 %v2542_v8  ;;  %2378 = vmatprep.subr.bf16.mxu1 %v2706_v9  ;;  %v2547_v14 = vld [vmem:[%s3343_s3 + $0x18] sm:$0xff]   ;;  %v2246_v22 = vld [vmem:[%s3345_s2] ss:$0 sm:$0xff]  ;;  %v2550_v27 = vld [vmem:[%s3343_s3 + $0x28] sm:$0xff]   ;;  %s2329_s2 = sshll.u32 %s2824_s28, 7 }
  0x1e   : > { %s2244_s22 = sshll.u32 %s541_s21, 3  ;;  %2402 = vmatprep.subr.bf16.mxu0 %v2706_v9  ;;  %v2548_v15 = vld [vmem:[%s3343_s3 + $0x58] sm:$0xff]   ;;  %s3344_s21 = sld [smem:[#allocation9_spill]]  ;;  %v2549_v25 = vld [vmem:[%s3343_s3 + $0x20] sm:$0xff]   ;;  %v2551_v28 = vld [vmem:[%s3343_s3 + $0x30] sm:$0xff]  }
  0x1f   : > { %s2856_s18 = scalar_lea.vmem %s3342_s30, %s2244_s22  ;;  %v2552_v29 = vld [vmem:[%s3343_s3 + $0x38] sm:$0xff]   ;;  %v2553_v30 = vld [vmem:[%s3343_s3 + $0x60] sm:$0xff]   ;;  %v2554_v31 = vld [vmem:[%s3343_s3 + $0x68] sm:$0xff]   ;;  %s2710_s30 = smov 96  }
  0x20   : > { %v545_v0 = vld [vmem:[%s2856_s18] sm:$0xff]  ;;  %2379 = vmatpush3.bf16.msra.mxu1 %v2543_v10  ;;  %v2555_v32 = vld [vmem:[%s3343_s3 + $0x70] sm:$0xff]   ;;  %v2556_v33 = vld [vmem:[%s3343_s3 + $0x78] sm:$0xff]   ;;  %s537_s22 = sand.u32 1, %s2696_s25  }
  0x21   : > { %v549_v1 = vsel %vm548_vm0, %v545_v0, 0.0  ;;  %2403 = vmatpush3.bf16.msra.mxu0 %v2544_v11  ;;  %2380 = vmatprep.subr.bf16.mxu1 %v2706_v9  ;;  %s2243_s29 = sshll.u32 %s537_s22, 3  ;;  %s2167_s28 = scalar_lea.sflag [#allocation3], %s537_s22 }
  0x22   : > { %550 = vadd.xlane.f32.xlu0 %v549_v1  ;;  %2404 = vmatprep.subr.bf16.mxu0 %v2706_v9 }
  0x24   : > { %2381 = vmatpush3.bf16.msra.mxu1 %v2545_v12  ;;  %v2245_v20 = vld [vmem:[%s3344_s21] ss:$0 sm:$0xff]  ;;  %s539_s21 = scalar_lea.vmem [#allocation2], %s2243_s29 }
  0x25   : > { %2405 = vmatpush3.bf16.msra.mxu0 %v2546_v13  ;;  %2382 = vmatprep.subr.bf16.mxu1 %v2706_v9  ;;  %s2180_s0 = sshll.u32 %s539_s21, 4  ;;  %s3271_s0 = int_to_ptr.vmem [resolvable:$true] %s2180_s0 }
  0x26   : > { %2406 = vmatprep.subr.bf16.mxu0 %v2706_v9  ;;  %s2642_s29 = scalar_lea.vmem %s3271_s0, 128 }
  0x27   : > { %p2643_p11 = scmp.ne.s32.totalorder %s3271_s0, %s2642_s29 }
  0x28   : > { %2383 = vmatpush3.bf16.msra.mxu1 %v2547_v14 }
  0x29   : > { %2407 = vmatpush3.bf16.msra.mxu0 %v2548_v15  ;;  %2388 = vmatprep.subr.bf16.mxu1 %v2706_v9  ;;  %p2644_p12 = pnand %p2643_p11, %p2841_p5 }
  0x2a   : > { %2436 = vmatprep.subr.bf16.mxu0 %v2706_v9 }
  0x2b   : > { %p2645_p13 = pneg %p2644_p12 }
  0xaf   : > { %v551_v2 = vpop.xlane.xlu0 %550 }
  0xb0   : > { %v553_v3 = vmul.f32 0.015625, %v551_v2 }
  0xb2   : > { %v554_v4 = vsub.f32 %v545_v0, %v553_v3 }
  0xb4   : > { %v555_v5 = vmul.f32 %v554_v4, %v554_v4 }
  0xb6   : > { %v556_v6 = vsel %vm548_vm0, %v555_v5, 0.0 }
  0xb7   : > { %557 = vadd.xlane.f32.xlu0 %v556_v6 }
 0x144   : > { %v558_v16 = vpop.xlane.xlu0 %557 }
 0x145   : > { %v559_v17 = vmul.f32 0.015625, %v558_v16 }
 0x147   : > { %v560_v18 = vadd.f32 1e-06, %v559_v17 }
 0x149   : > { %2597 = vrsqrt.f32 %v560_v18 }
 0x153   : > { %v2598_v19 = vpop.eup %2597 }
 0x154   : > { %v562_v21 = vmul.f32 %v2598_v19, %v554_v4 }
 0x156   : > { %v569_v23 = vmul.f32 %v2245_v20, %v562_v21 }
 0x158   : > { %v576_v24 = vadd.f32 %v2246_v22, %v569_v23 }
 0x15a   : > { %v577_v26 = vpack.c.bf16 %v576_v24, %v576_v24 }
 0x15c   : > { %2385 = vmatmul.mubr.msk.bf16.vlgmr.msra.gmra.mrb[0].mxu1 %vm548_vm0, %v577_v26  ;;  %2409 = vmatmul.mubr.msk.bf16.vlgmr.msra.gmra.mrb[0].mxu0 %vm548_vm0, %v577_v26 }
 0x15d   : > { %2389 = vmatpush3.bf16.msra.mxu1 %v2549_v25  ;;  %2396 = vmatprep.mubr.msk.bf16.mxu1 %vm2707_vm1, %v2706_v9 }
 0x15e   : > { %2390 = vmatprep.subr.bf16.mxu1 %v2706_v9  ;;  %2438 = vmatprep.mubr.msk.bf16.mxu0 %vm2707_vm1, %v2706_v9 }
 0x161   : > { %2391 = vmatpush3.bf16.msra.mxu1 %v2550_v27 }
 0x162   : > { %2392 = vmatprep.subr.bf16.mxu1 %v2706_v9 }
 0x165   : > { %2393 = vmatpush3.bf16.msra.mxu1 %v2551_v28 }
 0x166   : > { %2394 = vmatprep.subr.bf16.mxu1 %v2706_v9 }
 0x169   : > { %2395 = vmatpush3.bf16.msra.mxu1 %v2552_v29  ;;  %v2273_v29 = vld [vmem:[%s3319_s7] ss:$0 sm:$0xff] }
 0x16a   : > { %2412 = vmatprep.subr.bf16.mxu1 %v2706_v9 }
 0x16c   : > { %2397 = vmatmul.mubr.msk.bf16.vlgmr.msra.gmra.mrb[4].mxu1 %vm548_vm0, %v577_v26 }
 0x16d   : > { %2413 = vmatpush3.bf16.msra.mxu1 %v2553_v30  ;;  %2420 = vmatprep.mubr.msk.bf16.mxu1 %vm2707_vm1, %v2706_v9 }
 0x16e   : > { %2414 = vmatprep.subr.bf16.mxu1 %v2706_v9 }
 0x171   : > { %2415 = vmatpush3.bf16.msra.mxu1 %v2554_v31 }
 0x172   : > { %2416 = vmatprep.subr.bf16.mxu1 %v2706_v9 }
 0x175   : > { %2417 = vmatpush3.bf16.msra.mxu1 %v2555_v32  ;;  %v2274_v32 = vld [vmem:[%s3320_s8] ss:$0 sm:$0xff] }
 0x176   : > { %2418 = vmatprep.subr.bf16.mxu1 %v2706_v9 }
 0x179   : > { %2419 = vmatpush3.bf16.msra.mxu1 %v2556_v33 }
 0x17a   : > { %2424 = vmatprep.subr.bf16.mxu1 %v2706_v9 }
 0x17c   : > { %2421 = vmatmul.mubr.msk.bf16.vlgmr.msra.gmra.mrb[8].mxu1 %vm548_vm0, %v577_v26 }
 0x17d   : > { %2426 = vmatprep.mubr.msk.bf16.mxu1 %vm2707_vm1, %v2706_v9 }
 0x22f   : > { %v699_v36 = vpop.f32.mrb[0].mxu1  ;;  %v827_v37 = vpop.f32.mrb[0].mxu0 }
 0x230   : > { %v2955_v38 = vadd.f32 %v2247_v34, %v699_v36  ;;  %v2957_v39 = vadd.f32 %v2249_v35, %v827_v37  ;;  %v2386_v40 = vpop.f32.mrb[1].mxu1  ;;  %v2410_v41 = vpop.f32.mrb[1].mxu0 }
 0x231   : > { %v702_v42 = vpop.f32.mrb[2].mxu1  ;;  %v830_v43 = vpop.f32.mrb[2].mxu0 }
 0x232   : > { %983 = vrot.lane.b32.xlu0 %v2957_v39, %s2708_s19  ;;  %v2411_v44 = vpop.f32.mrb[3].mxu0  ;;  %979 = vrot.lane.b32.xlu1 %v2955_v38, %s2708_s19  ;;  %v2387_v45 = vpop.f32.mrb[3].mxu1  ;;  %v900_v21 = vsel %vm899_vm2, %v2955_v38, 0.0  ;;  %v906_v22 = vsel %vm899_vm2, %v2957_v39, 0.0 }
 0x23f   : > { %v763_v47 = vpop.f32.mrb[4].mxu1 }
 0x240   : > { %v2966_v48 = vadd.f32 %v2248_v46, %v763_v47  ;;  %v2398_v49 = vpop.f32.mrb[5].mxu1 }
 0x241   : > { %v766_v50 = vpop.f32.mrb[6].mxu1 }
 0x242   : > { %981 = vrot.lane.b32.xlu1 %v2966_v48, %s2708_s19  ;;  %v2399_v51 = vpop.f32.mrb[7].mxu1  ;;  %v903_v19 = vsel %vm899_vm2, %v2966_v48, 0.0 }
 0x24f   : > { %v891_v53 = vpop.f32.mrb[8].mxu1 }
 0x250   : > { %v2973_v54 = vadd.f32 %v2250_v52, %v891_v53  ;;  %v2422_v55 = vpop.f32.mrb[9].mxu1 }
 0x251   : > { %v894_v56 = vpop.f32.mrb[10].mxu1 }
 0x252   : > { %985 = vrot.lane.b32.xlu1 %v2973_v54, %s2708_s19  ;;  %v2423_v57 = vpop.f32.mrb[11].mxu1  ;;  %v909_v20 = vsel %vm899_vm2, %v2973_v54, 0.0 }
 0x2a4   : > { %v980_v58 = vpop.permute.xlu1 %979  ;;  %v984_v60 = vpop.permute.xlu0 %983 }
 0x2a5   : > { %v991_v59 = vsel %vm899_vm2, %v980_v58, 0.0  ;;  %v997_v61 = vsel %vm899_vm2, %v984_v60, 0.0 }
 0x2a6   : > { %992 = vadd.xlane.f32.xlu1 %v991_v59 }
 0x2aa   : > { %998 = vadd.xlane.f32.xlu1 %v997_v61 }
 0x2b4   : > { %v982_v62 = vpop.permute.xlu1 %981 }
 0x2b5   : > { %v994_v63 = vsel %vm899_vm2, %v982_v62, 0.0 }
 0x2b6   : > { %995 = vadd.xlane.f32.xlu0 %v994_v63 }
 0x2c4   : > { %v986_v0 = vpop.permute.xlu1 %985 }
 0x2c5   : > { %v1000_v1 = vsel %vm899_vm2, %v986_v0, 0.0 }
 0x2c6   : > { %1001 = vadd.xlane.f32.xlu1 %v1000_v1 }
 0x333   : > { %v993_v2 = vpop.xlane.xlu1 %992 }
 0x334   : > { %v1003_v3 = vmul.f32 0.0625, %v993_v2 }
 0x336   : > { %v2982_v4 = vsub.f32 %v2955_v38, %v1003_v3 }
 0x337   : > { %v999_v5 = vpop.xlane.xlu1 %998 }
 0x338   : > { %v1005_v6 = vmul.f32 0.0625, %v999_v5  ;;  %v1011_v7 = vmul.f32 %v2982_v4, %v2982_v4 }
 0x33a   : > { %v2987_v8 = vsub.f32 %v2957_v39, %v1005_v6  ;;  %1019 = vrot.lane.b32.xlu1 %v1011_v7, %s2708_s19 }
 0x33c   : > { %v1013_v10 = vmul.f32 %v2987_v8, %v2987_v8 }
 0x33e   : > { %1023 = vrot.lane.b32.xlu1 %v1013_v10, %s2708_s19 }
 0x343   : > { %v996_v11 = vpop.xlane.xlu0 %995 }
 0x344   : > { %v1004_v12 = vmul.f32 0.0625, %v996_v11 }
 0x346   : > { %v2994_v13 = vsub.f32 %v2966_v48, %v1004_v12 }
 0x348   : > { %v1012_v14 = vmul.f32 %v2994_v13, %v2994_v13 }
 0x34a   : > { %1021 = vrot.lane.b32.xlu0 %v1012_v14, %s2708_s19 }
 0x353   : > { %v1002_v15 = vpop.xlane.xlu1 %1001 }
 0x354   : > { %v1006_v16 = vmul.f32 0.0625, %v1002_v15 }
 0x356   : > { %v3000_v17 = vsub.f32 %v2973_v54, %v1006_v16 }
 0x358   : > { %v1014_v18 = vmul.f32 %v3000_v17, %v3000_v17 }
 0x35a   : > { %1025 = vrot.lane.b32.xlu1 %v1014_v18, %s2708_s19 }
 0x369   : > { %904 = vadd.xlane.f32.xlu0 %v903_v19 }
 0x36d   : > { %910 = vadd.xlane.f32.xlu0 %v909_v20 }
 0x37e   : > { %901 = vadd.xlane.f32.xlu1 %v900_v21 }
 0x382   : > { %907 = vadd.xlane.f32.xlu1 %v906_v22 }
 0x3ac   : > { %v1020_v23 = vpop.permute.xlu1 %1019 }
 0x3ad   : > { %v1031_v24 = vsel %vm899_vm2, %v1020_v23, 0.0 }
 0x3ae   : > { %1032 = vadd.xlane.f32.xlu0 %v1031_v24 }
 0x3b0   : > { %v1024_v25 = vpop.permute.xlu1 %1023 }
 0x3b1   : > { %v1037_v26 = vsel %vm899_vm2, %v1024_v25, 0.0 }
 0x3b2   : > { %1038 = vadd.xlane.f32.xlu0 %v1037_v26 }
 0x3bc   : > { %v1022_v27 = vpop.permute.xlu0 %1021 }
 0x3bd   : > { %v1034_v28 = vsel %vm899_vm2, %v1022_v27, 0.0 }
 0x3be   : > { %1035 = vadd.xlane.f32.xlu1 %v1034_v28 }
 0x3c8   : > { %1064 = vrot.lane.b32.xlu0 %v2273_v29, %s2709_s26 }
 0x3cc   : > { %v1026_v30 = vpop.permute.xlu1 %1025 }
 0x3cd   : > { %v1040_v31 = vsel %vm899_vm2, %v1026_v30, 0.0 }
 0x3ce   : > { %1041 = vadd.xlane.f32.xlu1 %v1040_v31 }
 0x3df   : > { %1076 = vrot.lane.b32.xlu1 %v2274_v32, %s2709_s26 }
 0x3f6   : > { %v905_v33 = vpop.xlane.xlu0 %904 }
 0x3f7   : > { %v914_v34 = vmul.f32 0.0625, %v905_v33 }
 0x3f9   : > { %v3024_v35 = vsub.f32 %v2966_v48, %v914_v34 }
 0x3fa   : > { %v911_v40 = vpop.xlane.xlu0 %910 }
 0x3fb   : > { %v922_v36 = vmul.f32 %v3024_v35, %v3024_v35  ;;  %v916_v41 = vmul.f32 0.0625, %v911_v40 }
 0x3fd   : > { %v928_v37 = vsel %vm899_vm2, %v922_v36, 0.0  ;;  %v3030_v44 = vsub.f32 %v2973_v54, %v916_v41 }
 0x3fe   : > { %929 = vadd.xlane.f32.xlu0 %v928_v37 }
 0x3ff   : > { %v924_v52 = vmul.f32 %v3030_v44, %v3030_v44 }
 0x401   : > { %v934_v56 = vsel %vm899_vm2, %v924_v52, 0.0 }
 0x40b   : > { %v902_v42 = vpop.xlane.xlu1 %901 }
 0x40c   : > { %v913_v43 = vmul.f32 0.0625, %v902_v42 }
 0x40e   : > { %v3033_v45 = vsub.f32 %v2955_v38, %v913_v43 }
 0x40f   : > { %v908_v46 = vpop.xlane.xlu1 %907 }
 0x410   : > { %v915_v47 = vmul.f32 0.0625, %v908_v46  ;;  %v921_v49 = vmul.f32 %v3033_v45, %v3033_v45 }
 0x412   : > { %v3038_v50 = vsub.f32 %v2957_v39, %v915_v47  ;;  %v925_v51 = vsel %vm899_vm2, %v921_v49, 0.0  ;;  %v2271_v49 = vld [vmem:[%s3317_s5] ss:$0 sm:$0xff] }
 0x413   : > { %926 = vadd.xlane.f32.xlu1 %v925_v51 }
 0x414   : > { %v923_v53 = vmul.f32 %v3038_v50, %v3038_v50 }
 0x416   : > { %v931_v55 = vsel %vm899_vm2, %v923_v53, 0.0 }
 0x417   : > { %932 = vadd.xlane.f32.xlu0 %v931_v55  ;;  %935 = vadd.xlane.f32.xlu1 %v934_v56 }
 0x43b   : > { %v1033_v57 = vpop.xlane.xlu0 %1032 }
 0x43c   : > { %v1043_v59 = vmul.f32 0.0625, %v1033_v57 }
 0x43e   : > { %v1047_v61 = vadd.f32 1e-06, %v1043_v59 }
 0x43f   : > { %v1039_v58 = vpop.xlane.xlu0 %1038 }
 0x440   : > { %v1045_v60 = vmul.f32 0.0625, %v1039_v58  ;;  %2599 = vrsqrt.f32 %v1047_v61  ;;  %v2272_v58 = vld [vmem:[%s3318_s6] ss:$0 sm:$0xff] }
 0x442   : > { %v1049_v62 = vadd.f32 1e-06, %v1045_v60 }
 0x443   : > { %v1065_v10 = vpop.permute.xlu0 %1064 }
 0x444   : > { %2601 = vrsqrt.f32 %v1049_v62 }
 0x44a   : > { %v2600_v2 = vpop.eup %2599 }
 0x44b   : > { %v1036_v63 = vpop.xlane.xlu1 %1035  ;;  %v1055_v6 = vmul.f32 %v2600_v2, %v2982_v4 }
 0x44c   : > { %v1044_v0 = vmul.f32 0.0625, %v1036_v63 }
 0x44d   : > { %v1067_v16 = vmul.f32 %v1065_v10, %v1055_v6 }
 0x44e   : > { %v1048_v1 = vadd.f32 1e-06, %v1044_v0  ;;  %v2602_v3 = vpop.eup %2601 }
 0x44f   : > { %v1057_v12 = vmul.f32 %v2602_v3, %v2987_v8 }
 0x450   : > { %2603 = vrsqrt.f32 %v1048_v1 }
 0x451   : > { %v1069_v20 = vmul.f32 %v1065_v10, %v1057_v12 }
 0x45a   : > { %v2604_v5 = vpop.eup %2603 }
 0x45b   : > { %v1056_v7 = vmul.f32 %v2604_v5, %v2994_v13  ;;  %v1042_v11 = vpop.xlane.xlu1 %1041 }
 0x45c   : > { %v1046_v14 = vmul.f32 0.0625, %v1042_v11 }
 0x45d   : > { %v1068_v15 = vmul.f32 %v1065_v10, %v1056_v7 }
 0x45e   : > { %v1050_v18 = vadd.f32 1e-06, %v1046_v14 }
 0x45f   : > { %v1077_v19 = vpop.permute.xlu1 %1076 }
 0x460   : > { %2605 = vrsqrt.f32 %v1050_v18  ;;  %v1080_v21 = vadd.f32 %v1077_v19, %v1068_v15  ;;  %v1079_v22 = vadd.f32 %v1077_v19, %v1067_v16  ;;  %v1081_v25 = vadd.f32 %v1077_v19, %v1069_v20 }
 0x462   : > { %v1088_v23 = vpack.c.bf16 %v1080_v21, %v1080_v21  ;;  %v1087_v24 = vpack.c.bf16 %v1079_v22, %v1079_v22  ;;  %v1089_v4 = vpack.c.bf16 %v1081_v25, %v1081_v25 }
 0x464   : > { %1141 = vrot.lane.b32.xlu1 %v1088_v23, %s2708_s19  ;;  %1092 = vrot.lane.b32.xlu0 %v1087_v24, %s2708_s19 }
 0x468   : > { %1190 = vrot.lane.b32.xlu1 %v1089_v4, %s2708_s19 }
 0x46a   : > { %v2606_v8 = vpop.eup %2605 }
 0x46b   : > { %v1058_v13 = vmul.f32 %v2606_v8, %v3000_v17 }
 0x46d   : > { %v1070_v26 = vmul.f32 %v1065_v10, %v1058_v13 }
 0x46f   : > { %v1082_v27 = vadd.f32 %v1077_v19, %v1070_v26 }
 0x471   : > { %v1090_v28 = vpack.c.bf16 %v1082_v27, %v1082_v27 }
 0x473   : > { %1239 = vrot.lane.b32.xlu0 %v1090_v28, %s2708_s19 }
 0x48b   : > { %v930_v29 = vpop.xlane.xlu0 %929 }
 0x48c   : > { %v938_v36 = vmul.f32 0.0625, %v930_v29 }
 0x48e   : > { %v942_v40 = vadd.f32 1e-06, %v938_v36 }
 0x4a0   : > { %v927_v30 = vpop.xlane.xlu1 %926 }
 0x4a1   : > { %v937_v31 = vmul.f32 0.0625, %v927_v30 }
 0x4a3   : > { %v941_v33 = vadd.f32 1e-06, %v937_v31 }
 0x4a4   : > { %v933_v32 = vpop.xlane.xlu0 %932  ;;  %v936_v41 = vpop.xlane.xlu1 %935 }
 0x4a5   : > { %v939_v34 = vmul.f32 0.0625, %v933_v32  ;;  %2607 = vrsqrt.f32 %v941_v33  ;;  %v940_v42 = vmul.f32 0.0625, %v936_v41 }
 0x4a7   : > { %v943_v37 = vadd.f32 1e-06, %v939_v34  ;;  %v944_v43 = vadd.f32 1e-06, %v940_v42 }
 0x4a9   : > { %2609 = vrsqrt.f32 %v943_v37  ;;  %v1341_v37 = vpack.c.bf16 %v2966_v48, %v2966_v48 }
 0x4aa   : > { %2611 = vrsqrt.f32 %v942_v40  ;;  %v1340_v40 = vpack.c.bf16 %v2955_v38, %v2955_v38 }
 0x4ab   : > { %2613 = vrsqrt.f32 %v944_v43 }
 0x4af   : > { %v2608_v17 = vpop.eup %2607 }
 0x4b0   : > { %v949_v46 = vmul.f32 %v2608_v17, %v3033_v45 }
 0x4b2   : > { %v959_v52 = vmul.f32 %v2271_v49, %v949_v46 }
 0x4b3   : > { %v2610_v47 = vpop.eup %2609 }
 0x4b4   : > { %v951_v51 = vmul.f32 %v2610_v47, %v3038_v50  ;;  %v2612_v53 = vpop.eup %2611  ;;  %v969_v59 = vadd.f32 %v2272_v58, %v959_v52 }
 0x4b5   : > { %v950_v45 = vmul.f32 %v2612_v53, %v3024_v35  ;;  %v2614_v1 = vpop.eup %2613 }
 0x4b6   : > { %v961_v60 = vmul.f32 %v2271_v49, %v951_v51  ;;  %v1083_v62 = vpack.c.bf16 %v969_v59, %v969_v59  ;;  %v952_v35 = vmul.f32 %v2614_v1, %v3030_v44  ;;  %v1342_v1 = vpack.c.bf16 %v2957_v39, %v2957_v39 }
 0x4b7   : > { %v960_v0 = vmul.f32 %v2271_v49, %v950_v45 }
 0x4b8   : > { %v971_v63 = vadd.f32 %v2272_v58, %v961_v60  ;;  %v962_v10 = vmul.f32 %v2271_v49, %v952_v35 }
 0x4b9   : > { %v970_v5 = vadd.f32 %v2272_v58, %v960_v0 }
 0x4ba   : > { %v1085_v3 = vpack.c.bf16 %v971_v63, %v971_v63  ;;  %v972_v44 = vadd.f32 %v2272_v58, %v962_v10 }
 0x4bb   : > { %v1084_v7 = vpack.c.bf16 %v970_v5, %v970_v5 }
 0x4bc   : > { %v1086_v12 = vpack.c.bf16 %v972_v44, %v972_v44 }
 0x4d6   : > { %v1142_v55 = vpop.permute.xlu1 %1141  ;;  %v1093_v56 = vpop.permute.xlu0 %1092 }
 0x4d7   : > { %v1098_v57 = vsel %vm899_vm2, %v1093_v56, 0  ;;  %v1147_v2 = vsel %vm899_vm2, %v1142_v55, 0 }
 0x4d8   : > { %2425 = vmatpush3.bf16.xpose.msra.mxu1 %v1098_v57 }
 0x4d9   : > { %2430 = vmatprep.subr.bf16.mxu1 %v2706_v9 }
 0x4da   : > { %v1191_v61 = vpop.permute.xlu1 %1190 }
 0x4db   : > { %v1196_v50 = vsel %vm899_vm2, %v1191_v61, 0 }
 0x4dc   : > { %2437 = vmatpush3.bf16.xpose.msra.mxu0 %v1196_v50 }
 0x4dd   : > { %2448 = vmatprep.subr.bf16.mxu0 %v2706_v9 }
 0x4df   : > { %2427 = vmatmul.mubr.msk.bf16.vlgmr.msra.gmra.mrb[12].mxu1 %vm899_vm2, %v1083_v62 }
 0x4e0   : > { %2431 = vmatpush3.bf16.xpose.msra.mxu1 %v1147_v2  ;;  %2432 = vmatprep.mubr.msk.bf16.mxu1 %vm2707_vm1, %v2706_v9  ;;  %v1343_v2 = vpack.c.bf16 %v2973_v54, %v2973_v54 }
 0x4e1   : > { %2442 = vmatprep.subr.bf16.mxu1 %v2706_v9 }
 0x4e3   : > { %2439 = vmatmul.mubr.msk.bf16.vlgmr.msra.gmra.mrb[4].mxu0 %vm899_vm2, %v1085_v3 }
 0x4e4   : > { %2450 = vmatprep.mubr.msk.bf16.mxu0 %vm2707_vm1, %v2706_v9 }
 0x4e5   : > { %v1240_v6 = vpop.permute.xlu0 %1239 }
 0x4e6   : > { %v1245_v11 = vsel %vm899_vm2, %v1240_v6, 0 }
 0x4e7   : > { %2433 = vmatmul.mubr.msk.bf16.vlgmr.msra.gmra.mrb[16].mxu1 %vm899_vm2, %v1084_v7 }
 0x4e8   : > { %2443 = vmatpush3.bf16.xpose.msra.mxu1 %v1245_v11  ;;  %2444 = vmatprep.mubr.msk.bf16.mxu1 %vm2707_vm1, %v2706_v9 }
 0x4e9   : > { %2454 = vmatprep.subr.bf16.mxu1 %v2706_v9 }
 0x4ef   : > { %2445 = vmatmul.mubr.msk.bf16.vlgmr.msra.gmra.mrb[20].mxu1 %vm899_vm2, %v1086_v12 }
 0x4f0   : > { %2456 = vmatprep.mubr.msk.bf16.mxu1 %vm2707_vm1, %v2706_v9 }
 0x5b2   : > { %v1134_v14 = vpop.f32.mrb[12].mxu1 }
 0x5b3   : > { %v1287_v15 = vmul.f32 0.25, %v1134_v14  ;;  %v2428_v16 = vpop.f32.mrb[13].mxu1 }
 0x5b4   : > { %v1137_v18 = vpop.f32.mrb[14].mxu1 }
 0x5b5   : > { %v2429_v19 = vpop.f32.mrb[15].mxu1  ;;  %v1292_v20 = vsel %vm1291_vm3, %v1287_v15, -inf }
 0x5b6   : > { %v1232_v21 = vpop.f32.mrb[4].mxu0  ;;  %1293 = vmax.xlane.f32.xlu1 %v1292_v20 }
 0x5b7   : > { %v2440_v22 = vpop.f32.mrb[5].mxu0  ;;  %v1289_v26 = vmul.f32 0.25, %v1232_v21 }
 0x5b8   : > { %v1235_v23 = vpop.f32.mrb[6].mxu0 }
 0x5b9   : > { %v2441_v24 = vpop.f32.mrb[7].mxu0  ;;  %v1298_v29 = vsel %vm1291_vm3, %v1289_v26, -inf }
 0x5ba   : > { %v1183_v25 = vpop.f32.mrb[16].mxu1  ;;  %v2557_v24 = vld [vmem:[%s3321_s9] sm:$0xff]  }
 0x5bb   : > { %v1288_v4 = vmul.f32 0.25, %v1183_v25  ;;  %v2434_v8 = vpop.f32.mrb[17].mxu1  ;;  %v2558_v25 = vld [vmem:[%s3321_s9 + $0x8] sm:$0xff]  }
 0x5bc   : > { %v1186_v13 = vpop.f32.mrb[18].mxu1  ;;  %v2559_v8 = vld [vmem:[%s3321_s9 + $0x10] sm:$0xff]  }
 0x5bd   : > { %v2435_v27 = vpop.f32.mrb[19].mxu1  ;;  %v1295_v28 = vsel %vm1291_vm3, %v1288_v4, -inf }
 0x5be   : > { %1296 = vmax.xlane.f32.xlu0 %v1295_v28 }
 0x5c2   : > { %1299 = vmax.xlane.f32.xlu0 %v1298_v29  ;;  %v1281_v30 = vpop.f32.mrb[20].mxu1 }
 0x5c3   : > { %v1290_v31 = vmul.f32 0.25, %v1281_v30  ;;  %v2446_v32 = vpop.f32.mrb[21].mxu1  ;;  %v2560_v30 = vld [vmem:[%s3321_s9 + $0x18] sm:$0xff]  }
 0x5c4   : > { %v1284_v33 = vpop.f32.mrb[22].mxu1 }
 0x5c5   : > { %v2447_v34 = vpop.f32.mrb[23].mxu1  ;;  %v1301_v36 = vsel %vm1291_vm3, %v1290_v31, -inf }
 0x5c6   : > { %1302 = vmax.xlane.f32.xlu1 %v1301_v36 }
 0x5d7   : > { %1395 = vrot.lane.b32.xlu1 %v1341_v37, %s2710_s30 }
 0x5d8   : > { %1345 = vrot.lane.b32.xlu0 %v1340_v40, %s2710_s30 }
 0x643   : > { %v1294_v41 = vpop.xlane.xlu1 %1293 }
 0x644   : > { %v1304_v42 = vsub.f32 %v1287_v15, %v1294_v41 }
 0x646   : > { %v1308_v17 = vmul.f32 1.442695, %v1304_v42 }
 0x648   : > { %2615 = vpow2.f32 %v1308_v17 }
 0x64b   : > { %v1297_v43 = vpop.xlane.xlu0 %1296 }
 0x64c   : > { %v1305_v46 = vsub.f32 %v1288_v4, %v1297_v43 }
 0x64e   : > { %v1310_v47 = vmul.f32 1.442695, %v1305_v46 }
 0x64f   : > { %v1300_v49 = vpop.xlane.xlu0 %1299 }
 0x650   : > { %2617 = vpow2.f32 %v1310_v47  ;;  %v1306_v51 = vsub.f32 %v1289_v26, %v1300_v49 }
 0x652   : > { %v2616_v48 = vpop.eup %2615  ;;  %v1312_v52 = vmul.f32 1.442695, %v1306_v51 }
 0x653   : > { %v1346_v53 = vpop.permute.xlu0 %1345  ;;  %v1303_v38 = vpop.xlane.xlu1 %1302  ;;  %v1316_v55 = vsel %vm1291_vm3, %v2616_v48, 0.0 }
 0x654   : > { %2619 = vpow2.f32 %v1312_v52  ;;  %v1352_v56 = vsel %vm1350_vm4, %v1346_v53, 0  ;;  %v1307_v57 = vsub.f32 %v1290_v31, %v1303_v38  ;;  %1317 = vadd.xlane.f32.xlu0 %v1316_v55 }
 0x655   : > { %2449 = vmatpush3.bf16.msra.mxu0 %v1352_v56 }
 0x656   : > { %v1314_v58 = vmul.f32 1.442695, %v1307_v57  ;;  %2460 = vmatprep.subr.bf16.mxu0 %v2706_v9 }
 0x657   : > { %v1396_v45 = vpop.permute.xlu1 %1395 }
 0x658   : > { %2621 = vpow2.f32 %v1314_v58  ;;  %v1401_v59 = vsel %vm1350_vm4, %v1396_v45, 0 }
 0x659   : > { %2455 = vmatpush3.bf16.msra.mxu1 %v1401_v59 }
 0x65a   : > { %v2618_v60 = vpop.eup %2617  ;;  %2466 = vmatprep.subr.bf16.mxu1 %v2706_v9 }
 0x65b   : > { %v1319_v61 = vsel %vm1291_vm3, %v2618_v60, 0.0 }
 0x65c   : > { %1320 = vadd.xlane.f32.xlu1 %v1319_v61 }
 0x65e   : > { %v2620_v50 = vpop.eup %2619 }
 0x65f   : > { %v1322_v62 = vsel %vm1291_vm3, %v2620_v50, 0.0 }
 0x660   : > { %1323 = vadd.xlane.f32.xlu0 %v1322_v62 }
 0x662   : > { %v2622_v63 = vpop.eup %2621 }
 0x663   : > { %v1325_v0 = vsel %vm1291_vm3, %v2622_v63, 0.0 }
 0x664   : > { %1326 = vadd.xlane.f32.xlu1 %v1325_v0 }
 0x675   : > { %1444 = vrot.lane.b32.xlu1 %v1342_v1, %s2710_s30 }
 0x676   : > { %1493 = vrot.lane.b32.xlu0 %v1343_v2, %s2710_s30  ;;  %v2291_v2 = vld [vmem:[%s3322_s10] ss:$0 sm:$0xff]  ;;  %s2712_s30 = smov [#allocation2]  }
 0x677   : > { %s2646_s26 = sshll.u32 %s2712_s30, 4  ;;  %s2647_s26 = int_to_ptr.vmem [resolvable:$false] %s2646_s26 }
 0x678   : > { %s2648_s3 = scalar_lea.vmem %s2647_s26, 256  ;;  %p2649_p0 = scmp.lt.s32.totalorder %s3271_s0, %s2647_s26 }
 0x679   : > { %p2650_p1 = scmp.lt.s32.totalorder %s2648_s3, %s2642_s29 }
 0x67b   : > { %p2651_p2 = por %p2650_p1, %p2649_p0 }
 0x67d   : > { %p2652_p3 = pnand %p2651_p2, %p2645_p13 }
 0x6e1   : > { %v1318_v35 = vpop.xlane.xlu0 %1317 }
 0x6e2   : > { %2623 = vrcp.f32 %v1318_v35 }
 0x6e9   : > { %v1321_v3 = vpop.xlane.xlu1 %1320 }
 0x6ea   : > { %2625 = vrcp.f32 %v1321_v3 }
 0x6ec   : > { %v2624_v5 = vpop.eup %2623 }
 0x6ed   : > { %v1332_v6 = vmul.f32 %v2624_v5, %v2616_v48  ;;  %v1324_v7 = vpop.xlane.xlu0 %1323 }
 0x6ee   : > { %2627 = vrcp.f32 %v1324_v7 }
 0x6ef   : > { %v1336_v10 = vpack.c.bf16 %v1332_v6, %v1332_v6 }
 0x6f1   : > { %2451 = vmatmul.mubr.msk.bf16.vlgmr.msra.gmra.mrb[8].mxu0 %vm1291_vm3, %v1336_v10  ;;  %v1327_v11 = vpop.xlane.xlu1 %1326  ;;  %v1494_v12 = vpop.permute.xlu0 %1493  ;;  %v2641_v10 = vld [vmem:[%s2856_s18] sm:$0xff]  ;;  %s3269_s18 = scalar_lea.hbm %s3329_s17, %s2329_s2 }
 0x6f2   : > { %2629 = vrcp.f32 %v1327_v11  ;;  %2462 = vmatprep.mubr.msk.bf16.mxu0 %vm2707_vm1, %v2706_v9  ;;  %v1499_v19 = vsel %vm1350_vm4, %v1494_v12, 0 }
 0x6f4   : > { %v2626_v39 = vpop.eup %2625 }
 0x6f5   : > { %v1333_v54 = vmul.f32 %v2626_v39, %v2618_v60  ;;  %v1445_v44 = vpop.permute.xlu1 %1444 }
 0x6f6   : > { %v1450_v14 = vsel %vm1350_vm4, %v1445_v44, 0 }
 0x6f7   : > { %2461 = vmatpush3.bf16.msra.mxu0 %v1450_v14  ;;  %v1337_v15 = vpack.c.bf16 %v1333_v54, %v1333_v54 }
 0x6f8   : > { %v2628_v16 = vpop.eup %2627  ;;  %2472 = vmatprep.subr.bf16.mxu0 %v2706_v9 }
 0x6f9   : > { %v1334_v18 = vmul.f32 %v2628_v16, %v2620_v50  ;;  %2457 = vmatmul.mubr.msk.bf16.vlgmr.msra.gmra.mrb[24].mxu1 %vm1291_vm3, %v1337_v15  ;;  %v2563_v16 = vld [vmem:[%s3325_s13 + $0x4] ss:$8 sps:$4 sm:$0xff]  }
 0x6fa   : > { %2467 = vmatpush3.bf16.msra.mxu1 %v1499_v19  ;;  %2468 = vmatprep.mubr.msk.bf16.mxu1 %vm2707_vm1, %v2706_v9  ;;  %v2561_v19 = vld [vmem:[%s3325_s13] ss:$8 sps:$4 sm:$0xff]  }
 0x6fb   : > { %v1338_v20 = vpack.c.bf16 %v1334_v18, %v1334_v18  ;;  %2478 = vmatprep.subr.bf16.mxu1 %v2706_v9  ;;  %v2566_v18 = vld [vmem:[%s3325_s13 + $0x44] ss:$8 sps:$4 sm:$0xff]  }
 0x6fc   : > { %v2630_v21 = vpop.eup %2629 }
 0x6fd   : > { %v1335_v22 = vmul.f32 %v2630_v21, %v2622_v63  ;;  %2463 = vmatmul.mubr.msk.bf16.vlgmr.msra.gmra.mrb[12].mxu0 %vm1291_vm3, %v1338_v20  ;;  %v2564_v20 = vld [vmem:[%s3325_s13 + $0x40] ss:$8 sps:$4 sm:$0xff]   ;;  %v2569_v21 = vld [vmem:[%s3325_s13 + $0x14] ss:$8 sps:$4 sm:$0xff]  }
 0x6fe   : > { %2474 = vmatprep.mubr.msk.bf16.mxu0 %vm2707_vm1, %v2706_v9  ;;  %2473 = vmatpush3.bf16.msra.mxu0 %v2557_v24  ;;  %v2570_v24 = vld [vmem:[%s3325_s13 + $0x50] ss:$8 sps:$4 sm:$0xff]  }
 0x6ff   : > { %v1339_v23 = vpack.c.bf16 %v1335_v22, %v1335_v22  ;;  %2484 = vmatprep.subr.bf16.mxu0 %v2706_v9  ;;  %v2572_v22 = vld [vmem:[%s3325_s13 + $0x54] ss:$8 sps:$4 sm:$0xff]  }
 0x701   : > { %2469 = vmatmul.mubr.msk.bf16.vlgmr.msra.gmra.mrb[28].mxu1 %vm1291_vm3, %v1339_v23  ;;  %v2567_v23 = vld [vmem:[%s3325_s13 + $0x10] ss:$8 sps:$4 sm:$0xff]  }
 0x702   : > { %2480 = vmatprep.mubr.msk.bf16.mxu1 %vm2707_vm1, %v2706_v9  ;;  %2479 = vmatpush3.bf16.msra.mxu1 %v2558_v25  ;;  %v2575_v25 = vld [vmem:[%s3325_s13 + $0x24] ss:$8 sps:$4 sm:$0xff]  }
 0x703   : > { %2490 = vmatprep.subr.bf16.mxu1 %v2706_v9 }
 0x7c4   : > { %v1388_v4 = vpop.f32.mrb[8].mxu0 }
 0x7c5   : > { %v1541_v13 = vpack.c.bf16 %v1388_v4, %v1388_v4  ;;  %v2452_v26 = vpop.f32.mrb[9].mxu0  ;;  %v2578_v4 = vld [vmem:[%s3325_s13 + $0x64] ss:$8 sps:$4 sm:$0xff]  }
 0x7c6   : > { %v1391_v27 = vpop.f32.mrb[10].mxu0  ;;  %v2579_v26 = vld [vmem:[%s3325_s13 + $0x30] ss:$8 sps:$4 sm:$0xff]  }
 0x7c7   : > { %v2453_v28 = vpop.f32.mrb[11].mxu0  ;;  %2475 = vmatmul.mubr.msk.bf16.vlgmr.msra.gmra.mrb[16].mxu0 %vm899_vm2, %v1541_v13  ;;  %v2576_v13 = vld [vmem:[%s3325_s13 + $0x60] ss:$8 sps:$4 sm:$0xff]   ;;  %v2581_v27 = vld [vmem:[%s3325_s13 + $0x34] ss:$8 sps:$4 sm:$0xff]  }
 0x7c8   : > { %2485 = vmatpush3.bf16.msra.mxu0 %v2559_v8  ;;  %2486 = vmatprep.mubr.msk.bf16.mxu0 %vm2707_vm1, %v2706_v9  ;;  %v2573_v8 = vld [vmem:[%s3325_s13 + $0x20] ss:$8 sps:$4 sm:$0xff]   ;;  %v2582_v28 = vld [vmem:[%s3325_s13 + $0x70] ss:$8 sps:$4 sm:$0xff]  }
 0x7c9   : > { %1878 = vmatprep.subr.bf16.mxu0 %v2563_v16 }
 0x7cc   : > { %v1437_v29 = vpop.f32.mrb[24].mxu1 }
 0x7cd   : > { %v1542_v31 = vpack.c.bf16 %v1437_v29, %v1437_v29  ;;  %v2458_v32 = vpop.f32.mrb[25].mxu1  ;;  %v2584_v29 = vld [vmem:[%s3325_s13 + $0x74] ss:$8 sps:$4 sm:$0xff]  }
 0x7ce   : > { %v1440_v33 = vpop.f32.mrb[26].mxu1 }
 0x7cf   : > { %v2459_v34 = vpop.f32.mrb[27].mxu1  ;;  %2481 = vmatmul.mubr.msk.bf16.vlgmr.msra.gmra.mrb[32].mxu1 %vm899_vm2, %v1542_v31 }
 0x7d0   : > { %v1486_v36 = vpop.f32.mrb[12].mxu0  ;;  %2491 = vmatpush3.bf16.msra.mxu1 %v2560_v30  ;;  %2492 = vmatprep.mubr.msk.bf16.mxu1 %vm2707_vm1, %v2706_v9  ;;  %v2711_v30 = vmov 0  }
 0x7d1   : > { %v1543_v37 = vpack.c.bf16 %v1486_v36, %v1486_v36  ;;  %v2464_v40 = vpop.f32.mrb[13].mxu0  ;;  %1959 = vmatprep.subr.bf16.mxu1 %v2566_v18  ;;  %v2292_v36 = vld [vmem:[%s3323_s11] ss:$0 sm:$0xff] }
 0x7d2   : > { %v1489_v41 = vpop.f32.mrb[14].mxu0  ;;  %v2293_v40 = vld [vmem:[%s3324_s12] ss:$0 sm:$0xff] }
 0x7d3   : > { %v2465_v42 = vpop.f32.mrb[15].mxu0  ;;  %2487 = vmatmul.mubr.msk.bf16.vlgmr.msra.gmra.mrb[20].mxu0 %vm899_vm2, %v1543_v37 }
 0x7d4   : > { %v1535_v17 = vpop.f32.mrb[28].mxu1  ;;  %1879 = vmatpush1.bf16.msra.mxu0 %v2561_v19  ;;  %1910 = vmatprep.mubr.bf16.mxu0 %v2711_v30 }
 0x7d5   : > { %v1544_v43 = vpack.c.bf16 %v1535_v17, %v1535_v17  ;;  %v2470_v46 = vpop.f32.mrb[29].mxu1  ;;  %1880 = vmatprep.subr.bf16.mxu0 %v2569_v21  ;;  %v2585_v17 = vld [vmem:[%s3327_s15] sm:$0xff]  }
 0x7d6   : > { %v1538_v47 = vpop.f32.mrb[30].mxu1  ;;  %v2586_v46 = vld [vmem:[%s3327_s15 + $0x8] sm:$0xff]  }
 0x7d7   : > { %v2471_v49 = vpop.f32.mrb[31].mxu1  ;;  %2493 = vmatmul.mubr.msk.bf16.vlgmr.msra.gmra.mrb[36].mxu1 %vm899_vm2, %v1544_v43  ;;  %v2587_v47 = vld [vmem:[%s3327_s15 + $0x10] sm:$0xff]  }
 0x7d8   : > { %1960 = vmatpush1.bf16.msra.mxu1 %v2564_v20  ;;  %1881 = vmatpush1.bf16.msra.mxu0 %v2567_v23  ;;  %v2588_v49 = vld [vmem:[%s3327_s15 + $0x18] sm:$0xff]  }
 0x7d9   : > { %1961 = vmatprep.subr.bf16.mxu1 %v2572_v22  ;;  %1882 = vmatprep.subr.bf16.mxu0 %v2575_v25 }
 0x7da   : > { %1991 = vmatprep.mubr.bf16.mxu1 %v2711_v30 }
 0x7dc   : > { %1962 = vmatpush1.bf16.msra.mxu1 %v2570_v24  ;;  %1883 = vmatpush1.bf16.msra.mxu0 %v2573_v8 }
 0x7dd   : > { %1963 = vmatprep.subr.bf16.mxu1 %v2578_v4  ;;  %1884 = vmatprep.subr.bf16.mxu0 %v2581_v27 }
 0x7e0   : > { %1964 = vmatpush1.bf16.msra.mxu1 %v2576_v13  ;;  %1885 = vmatpush1.bf16.msra.mxu0 %v2579_v26  ;;  %v2314_v26 = vld [vmem:[%s3328_s16] ss:$0 sm:$0xff] }
 0x7e1   : > { %1965 = vmatprep.subr.bf16.mxu1 %v2584_v29  ;;  %2124 = vmatprep.subr.bf16.mxu0 %v2711_v30 }
 0x7e4   : > { %1966 = vmatpush1.bf16.msra.mxu1 %v2582_v28 }
 0x89a   : > { %v1596_v51 = vpop.f32.mrb[16].mxu0 }
 0x89b   : > { %v2476_v48 = vpop.f32.mrb[17].mxu0  ;;  %v1749_v9 = vsel %vm548_vm0, %v1596_v51, 0.0  ;;  %v2589_v51 = vld [vmem:[%s3327_s15 + $0x20] sm:$0xff]  }
 0x89c   : > { %v1599_v52 = vpop.f32.mrb[18].mxu0  ;;  %v2590_v48 = vld [vmem:[%s3327_s15 + $0x28] sm:$0xff]  }
 0x89d   : > { %v2477_v53 = vpop.f32.mrb[19].mxu0  ;;  %v2591_v52 = vld [vmem:[%s3327_s15 + $0x30] sm:$0xff]  }
 0x89e   : > { %v2592_v53 = vld [vmem:[%s3327_s15 + $0x38] sm:$0xff]  }
 0x8a2   : > { %v1645_v38 = vpop.f32.mrb[32].mxu1 }
 0x8a3   : > { %v1750_v55 = vsel %vm548_vm0, %v1645_v38, 0.0  ;;  %v2482_v56 = vpop.f32.mrb[33].mxu1  ;;  %v2593_v38 = vld [vmem:[%s3327_s15 + $0x40] sm:$0xff]  }
 0x8a4   : > { %v1751_v57 = vadd.f32 %v1750_v55, %v1749_v9  ;;  %v1648_v58 = vpop.f32.mrb[34].mxu1  ;;  %v2594_v9 = vld [vmem:[%s3327_s15 + $0x48] sm:$0xff]   ;;  %v2595_v55 = vld [vmem:[%s3327_s15 + $0x50] sm:$0xff]   ;;  %v2596_v56 = vld [vmem:[%s3327_s15 + $0x58] sm:$0xff]  }
 0x8a5   : > { %v2483_v45 = vpop.f32.mrb[35].mxu1 }
 0x8a6   : > { %v1694_v59 = vpop.f32.mrb[20].mxu0 }
 0x8a7   : > { %v1752_v60 = vsel %vm548_vm0, %v1694_v59, 0.0  ;;  %v2488_v61 = vpop.f32.mrb[21].mxu0  ;;  %v1811_v59 = vld [vmem:[%s3326_s14] sm:$0x3] }
 0x8a8   : > { %v1753_v50 = vadd.f32 %v1752_v60, %v1751_v57  ;;  %v1697_v62 = vpop.f32.mrb[22].mxu0  ;;  %v1815_v57 = vlaneseq }
 0x8a9   : > { %v2489_v63 = vpop.f32.mrb[23].mxu0 }
 0x8aa   : > { %v1743_v0 = vpop.f32.mrb[36].mxu1  ;;  %v1816_v58 = vshrl.u32 %v1815_v57, 7 }
 0x8ab   : > { %v1754_v1 = vsel %vm548_vm0, %v1743_v0, 0.0  ;;  %v2494_v35 = vpop.f32.mrb[37].mxu1 }
 0x8ac   : > { %v1755_v3 = vadd.f32 %v1754_v1, %v1753_v50  ;;  %v1746_v5 = vpop.f32.mrb[38].mxu1  ;;  %v1817_v45 = vsub.s32 0, %v1816_v58  ;;  %v1821_v60 = vsub.s32 1, %v1816_v58 }
 0x8ad   : > { %v2495_v6 = vpop.f32.mrb[39].mxu1 }
 0x8ae   : > { %v1763_v7 = vadd.f32 %v2291_v2, %v1755_v3  ;;  %v1818_v61 = vrot.slane %v1811_v59, %v1817_v45  ;;  %v1822_v50 = vrot.slane %v1811_v59, %v1821_v60 }
 0x8b0   : > { %v3155_v11 = vadd.f32 %v2641_v10, %v1763_v7 }
 0x8b2   : > { %v1767_v39 = vsel %vm548_vm0, %v3155_v11, 0.0 }
 0x8b3   : > { %1768 = vadd.xlane.f32.xlu1 %v1767_v39 }
 0x940   : > { %v1769_v54 = vpop.xlane.xlu1 %1768 }
 0x941   : > { %v1770_v44 = vmul.f32 0.015625, %v1769_v54 }
 0x943   : > { %v1771_v12 = vsub.f32 %v3155_v11, %v1770_v44 }
 0x945   : > { %v1772_v14 = vmul.f32 %v1771_v12, %v1771_v12 }
 0x947   : > { %v1773_v15 = vsel %vm548_vm0, %v1772_v14, 0.0 }
 0x948   : > { %1774 = vadd.xlane.f32.xlu0 %v1773_v15  ;;  %v1812_v15 = vld [vmem:[%s3326_s14 + $0x2] sm:$0x3] }
 0x949   : > { %v1826_v16 = vrot.slane %v1812_v15, %v1817_v45  ;;  %v1830_v18 = vrot.slane %v1812_v15, %v1821_v60 }
 0x9d5   : > { %v1775_v31 = vpop.xlane.xlu0 %1774 }
 0x9d6   : > { %v1776_v32 = vmul.f32 0.015625, %v1775_v31 }
 0x9d8   : > { %v1777_v33 = vadd.f32 1e-06, %v1776_v32 }
 0x9da   : > { %2631 = vrsqrt.f32 %v1777_v33 }
 0x9e4   : > { %v2632_v34 = vpop.eup %2631 }
 0x9e5   : > { %v1779_v37 = vmul.f32 %v2632_v34, %v1771_v12 }
 0x9e7   : > { %v1786_v41 = vmul.f32 %v2292_v36, %v1779_v37 }
 0x9e9   : > { %v1793_v42 = vadd.f32 %v2293_v40, %v1786_v41 }
 0x9eb   : > { %v1794_v43 = vpack.c.bf16 %v1793_v42, %v1793_v42 }
 0x9ed   : > { %2302 = vmatmul.mubr.msk.bf16.vlgmr.msra.gmra.mrb[24].mxu0 %vm548_vm0, %v1794_v43  ;;  %2311 = vmatmul.mubr.msk.bf16.vlgmr.msra.gmra.mrb[40].mxu1 %vm548_vm0, %v1794_v43 }
 0x9ee   : > { %2125 = vmatpush1.bf16.msra.mxu0 %v2585_v17 }
 0x9ef   : > { %2126 = vmatprep.subr.bf16.mxu0 %v2711_v30 }
 0x9f2   : > { %2127 = vmatpush1.bf16.msra.mxu0 %v2586_v46 }
 0x9f3   : > { %2128 = vmatprep.subr.bf16.mxu0 %v2711_v30 }
 0x9f6   : > { %2129 = vmatpush1.bf16.msra.mxu0 %v2587_v47 }
 0x9f7   : > { %2130 = vmatprep.subr.bf16.mxu0 %v2711_v30 }
 0x9fa   : > { %2131 = vmatpush1.bf16.msra.mxu0 %v2588_v49 }
 0x9fb   : > { %2132 = vmatprep.subr.bf16.mxu0 %v2711_v30 }
 0x9fe   : > { %2133 = vmatpush1.bf16.msra.mxu0 %v2589_v51 }
 0x9ff   : > { %2134 = vmatprep.subr.bf16.mxu0 %v2711_v30 }
 0xa02   : > { %2135 = vmatpush1.bf16.msra.mxu0 %v2590_v48 }
 0xa03   : > { %2136 = vmatprep.subr.bf16.mxu0 %v2711_v30 }
 0xa06   : > { %2137 = vmatpush1.bf16.msra.mxu0 %v2591_v52 }
 0xa07   : > { %2138 = vmatprep.subr.bf16.mxu0 %v2711_v30 }
 0xa0a   : > { %2139 = vmatpush1.bf16.msra.mxu0 %v2592_v53 }
 0xa0b   : > { %2140 = vmatprep.subr.bf16.mxu0 %v2711_v30 }
 0xa0e   : > { %2141 = vmatpush1.bf16.msra.mxu0 %v2593_v38 }
 0xa0f   : > { %2142 = vmatprep.subr.bf16.mxu0 %v2711_v30 }
 0xa12   : > { %2143 = vmatpush1.bf16.msra.mxu0 %v2594_v9 }
 0xa13   : > { %2144 = vmatprep.subr.bf16.mxu0 %v2711_v30 }
 0xa16   : > { %2145 = vmatpush1.bf16.msra.mxu0 %v2595_v55 }
 0xa17   : > { %2146 = vmatprep.subr.bf16.mxu0 %v2711_v30 }
 0xa1a   : > { %2147 = vmatpush1.bf16.msra.mxu0 %v2596_v56 }
 0xac0   : > { %v1912_v62 = vpop.f32.mrb[24].mxu0  ;;  %v1993_v63 = vpop.f32.mrb[40].mxu1 }
 0xac1   : > { %v1913_v0 = vadd.f32 %v1912_v62, %v1818_v61  ;;  %v1914_v1 = vpop.f32.mrb[25].mxu0  ;;  %v1995_v2 = vpop.f32.mrb[41].mxu1  ;;  %v1994_v22 = vadd.f32 %v1993_v63, %v1826_v16 }
 0xac2   : > { %v1915_v35 = vadd.f32 %v1914_v1, %v1822_v50  ;;  %v1916_v3 = vpop.f32.mrb[26].mxu0  ;;  %v1997_v5 = vpop.f32.mrb[42].mxu1  ;;  %v1996_v24 = vadd.f32 %v1995_v2, %v1830_v18 }
 0xac3   : > { %v2312_v6 = vmul.f32 -1.442695, %v1913_v0  ;;  %v1917_v7 = vpop.f32.mrb[27].mxu0  ;;  %v1998_v10 = vpop.f32.mrb[43].mxu1 }
 0xac4   : > { %v2313_v39 = vmul.f32 -1.442695, %v1915_v35 }
 0xac5   : > { %2633 = vpow2.f32 %v2312_v6 }
 0xac6   : > { %2635 = vpow2.f32 %v2313_v39 }
 0xacf   : > { %v2634_v54 = vpop.eup %2633 }
 0xad0   : > { %v2636_v44 = vpop.eup %2635  ;;  %v2006_v12 = vadd.f32 1.0, %v2634_v54 }
 0xad1   : > { %v2007_v14 = vadd.f32 1.0, %v2636_v44 }
 0xad2   : > { %2637 = vrcp.f32 %v2006_v12 }
 0xad3   : > { %2639 = vrcp.f32 %v2007_v14 }
 0xadc   : > { %v2638_v19 = vpop.eup %2637 }
 0xadd   : > { %v2640_v20 = vpop.eup %2639  ;;  %v2012_v21 = vmul.f32 %v2638_v19, %v1913_v0 }
 0xade   : > { %v2013_v23 = vmul.f32 %v2640_v20, %v1915_v35 }
 0xadf   : > { %v2014_v25 = vmul.f32 %v2012_v21, %v1994_v22 }
 0xae0   : > { %v2015_v4 = vmul.f32 %v2013_v23, %v1996_v24 }
 0xae1   : > { %v2016_v13 = vpack.c.bf16 %v2014_v25, %v2014_v25 }
 0xae2   : > { %v2017_v8 = vpack.c.bf16 %v2015_v4, %v2015_v4 }
 0xae4   : > { %2327 = vmatprep.mubr.msk.bf16.mxu0 %vm548_vm0, %v2017_v8 }
 0xae5   : > { %2157 = vmatmul.mubr.bf16.vlgmr.msra.gmra.mrb[28].mxu0 %v2016_v13 }
 0xbb8   : > { %v2158_v27 = vpop.f32.mrb[28].mxu0 }
 0xbb9   : > { %v2159_v28 = vadd.f32 %v2314_v26, %v2158_v27  ;;  %v2160_v29 = vpop.f32.mrb[29].mxu0 }
 0xbba   : > { %v2161_v30 = vpop.f32.mrb[30].mxu0 }
 0xbbb   : > { %v2164_v31 = vadd.f32 %v2159_v28, %v3155_v11  ;;  %v2162_v32 = vpop.f32.mrb[31].mxu0 }
 0xbbd   : > { %2165 = vst.msk [vmem:[%s539_s21] sm:$0xff] %vm548_vm0, %v2164_v31 }
 0xbbe   : > { %2655 = shalt.err (!%p2652_p3)
}
 0xbbf   : > { %s2656_s22 = scalar_lea.hbm %s3269_s18, 128  ;;  %s2660_s19 = scalar_lea.hbm %s3329_s17, 256 }
 0xbc0   : > { %p2657_p4 = scmp.ne.s32.totalorder %s3269_s18, %s2656_s22  ;;  %p2661_p9 = scmp.lt.u32.totalorder %s3269_s18, %s3329_s17 }
 0xbc1   : > { %p2662_p10 = scmp.lt.u32.totalorder %s2660_s19, %s2656_s22  ;;  %p2664_p12 = scmp.lt.u32.totalorder %s2656_s22, %s3269_s18 }
 0xbc2   : > { %p2658_p7 = pnand %p2657_p4, %p2841_p5 }
 0xbc3   : > { %p2663_p11 = por %p2662_p10, %p2661_p9 }
 0xbc4   : > { %p2659_p8 = pneg %p2658_p7 }
 0xbc5   : > { %p2665_p13 = por %p2664_p12, %p2663_p11 }
 0xbc7   : > { %p2666_p0 = pnand %p2665_p13, %p2659_p8 }
 0xbc9   : > { %2669 = shalt.err (!%p2666_p0)
}
 0xbca   : > { %2496 = dma.vmem_to_hbm [thread:$0]  (%p2841_p5), %s3271_s0, 128, %s3269_s18, %s2167_s28  }
 0xbcb PF: > { %p2502_p1 = scmp.ge.s32.totalorder %s2704_s27, 2  ;;  %s2192_s3 = sand.u32 1, %s2692_s24  }
 0xbcc   : > { %s2193_s29 = scalar_lea.sflag [#allocation3], %s2192_s3 }
 0xbcd   : > { %p2499_p2 = pnand %p2502_p1, %p2845_p6 }
 0xbcf   : > { %2687 = dma.done.wait (!%p2499_p2), %s2193_s29, 128  }
 0xbd0   : > { %2689 = vsyncadd (!%p2499_p2), %s2193_s29, 4294967168  ;;  %s3346_s27 = sld [smem:[#allocation6_spill]]  ;;  %s3347_s26 = sld [smem:[#allocation5_spill]] }
 0xbd1   : > { %s3348_s22 = sld [smem:[#allocation7_spill]]  ;;  %s3349_s24 = smov %s2696_s25 }
 0xbd6   : > { %p27_p3 = scmp.ge.s32.totalorder %s3346_s27, 4   ;;  %s3350_s25 = smov %s3347_s26 }
 0xbd7   : > { %s3351_s26 = smov %s3348_s22 }
 0xbd8   :  { %29 = sbr.rel (!%p27_p3) target bundleno = 8 (0x8), region = 123 }
 0xbdf   :  { %2198 = vsyncpa [#allocation3], 1 }
 0xbe0   :  { %2200 = vsyncpa [#allocation3 + $0x1], 1 }

</bundles_post_ra>
